<compile_context>
chip_gen: v7x
topology: tpu7x:2x2x1
jax: 0.10.0
libtpu: 0.0.40
codegen_flags: <defaults>
</compile_context>

<pallas_src>
import functools

import jax
import jax.numpy as jnp
from jax import lax
from jax.experimental import pallas as pl
from jax.experimental.pallas import tpu as pltpu

# ----------------------------- configuration ------------------------------ #
MLP_DIM = 32
N_SAMPLE = 64          # small demo value (module default 1024)
RADIUS = 0.4
N_NEIGHBOR = 16        # small demo value (module default 128)
N_NEIGHBOR_POST = 16   # small demo value (module default 128)
BN_EPS = 1e-5

PACK = 4               # neighbors packed per LHS row (block-diag folded weights)
MIN_GRID_STEPS = 8     # keep >= 8 grid steps (v7x 2-TC megacore + pipelining)


@functools.lru_cache(maxsize=None)
def _hw_config():
    """(desired tile_m, scoped vmem_limit_bytes), generation-aware."""
    vmem_bytes = 64 * 1024 * 1024          # conservative default (v7x per-TC)
    try:
        vmem_bytes = int(pltpu.get_tpu_info().vmem_capacity_bytes)
    except Exception:
        pass
    if vmem_bytes >= 128 * 1024 * 1024:    # v5e / v6e: 128 MiB physical VMEM
        return 256, 64 * 1024 * 1024
    return 128, 28 * 1024 * 1024           # v7x: 64 MiB physical, leave headroom


def _compiler_params():
    _, vmem_limit = _hw_config()
    return pltpu.CompilerParams(
        dimension_semantics=("parallel",),
        vmem_limit_bytes=vmem_limit,
    )


def _choose_tile_m(m, desired, min_steps=MIN_GRID_STEPS):
    """Largest power-of-two-scaled tile (multiple of 8) giving >= min_steps grid steps."""
    t = desired
    while t > 8 and pl.cdiv(m, t) < min_steps:
        t //= 2
    return max(t, 8)


def _choose_pack(k, desired=PACK):
    p = min(desired, k)
    while p > 1 and k % p != 0:
        p -= 1
    return p


def _block_diag(w, p):
    """blockdiag(w, ..., w) with p copies: (p*Cin, p*Cout)."""
    if p == 1:
        return w
    return jnp.kron(jnp.eye(p, dtype=w.dtype), w)


# --------------------------- Pallas hot-path kernels ----------------------- #
def _mlp1_maxpool_kernel(g_ref, w1_ref, b1_ref, w2_ref, b2_ref, o_ref, *, kp, p, h2):
    """SharedMLP1 (two folded 1x1 conv+BN+ReLU) fused with the neighbor max-pool.

    g_ref: (kp, tile_m, p*cin) bf16, neighbor-chunk-major.  Weights are
    block-diagonal over the p packed neighbors.  Running max stays in vregs.
    """
    tile_m = o_ref.shape[0]
    w1 = w1_ref[...]
    w2 = w2_ref[...]
    # Hoist bias broadcasts out of the neighbor loop (broadcast_in_dim is not CSE'd).
    b1 = jnp.broadcast_to(b1_ref[...], (tile_m, w1.shape[1]))
    b2 = jnp.broadcast_to(b2_ref[...], (tile_m, w2.shape[1]))

    run_max = jnp.full((tile_m, w2.shape[1]), -jnp.inf, jnp.float32)
    for c in range(kp):                                  # static, fully unrolled
        x = g_ref[c]                                     # (tile_m, p*cin) bf16
        h = jnp.dot(x, w1, preferred_element_type=jnp.float32) + b1
        h = jnp.maximum(h, 0.0)
        y = jnp.dot(h.astype(w2.dtype), w2, preferred_element_type=jnp.float32) + b2
        y = jnp.maximum(y, 0.0)
        run_max = jnp.maximum(run_max, y)                # streaming VPU max

    pooled = run_max[:, 0:h2]                            # fold the p packed blocks
    for j in range(1, p):
        pooled = jnp.maximum(pooled, run_max[:, j * h2:(j + 1) * h2])
    o_ref[...] = pooled


def _mlp23_residual_kernel(g_ref, id_ref, w2_ref, b2_ref, w3_ref, b3_ref,
                           w4_ref, b4_ref, o_ref, *, kp, p, h2):
    """Fused SharedMLP2 (no activation) + neighbor max-pool + Conv1d bottleneck:
        nf2 = maxpool_k(conv_bn(grouped2))
        out = relu(conv_bn(relu(conv_bn(nf2))) + identity)
    The pooled (tile_m, 64) intermediate never leaves vregs/VMEM.
    """
    tile_m = o_ref.shape[0]
    w2 = w2_ref[...]
    b2 = jnp.broadcast_to(b2_ref[...], (tile_m, w2.shape[1]))

    run_max = jnp.full((tile_m, w2.shape[1]), -jnp.inf, jnp.float32)
    for c in range(kp):                                  # static, fully unrolled
        x = g_ref[c]                                     # (tile_m, p*cin) bf16
        y = jnp.dot(x, w2, preferred_element_type=jnp.float32) + b2   # no ReLU
        run_max = jnp.maximum(run_max, y)

    pooled = run_max[:, 0:h2]
    for j in range(1, p):
        pooled = jnp.maximum(pooled, run_max[:, j * h2:(j + 1) * h2])

    h3 = jnp.dot(pooled.astype(w3_ref.dtype), w3_ref[...],
                 preferred_element_type=jnp.float32) + b3_ref[...]
    h3 = jnp.maximum(h3, 0.0)
    y4 = jnp.dot(h3.astype(w4_ref.dtype), w4_ref[...],
                 preferred_element_type=jnp.float32) + b4_ref[...]
    o_ref[...] = jnp.maximum(y4 + id_ref[...], 0.0)


# ------------------------------ kernel wrappers ---------------------------- #
def run_mlp1(grouped, w1, b1, w2, b2, *, p):
    """grouped: (K/p, M, p*cin) bf16 -> (M, 64) f32."""
    kp, m, pcin = grouped.shape
    w1_blk = _block_diag(w1, p)                          # (p*cin, p*32) bf16
    w2_blk = _block_diag(w2, p)                          # (p*32, p*64) bf16
    b1_blk = jnp.tile(b1, (1, p))                        # (1, p*32) f32
    b2_blk = jnp.tile(b2, (1, p))                        # (1, p*64) f32
    ph1, ph2 = w1_blk.shape[1], w2_blk.shape[1]
    h2 = ph2 // p

    desired_tile, _ = _hw_config()
    tile_m = _choose_tile_m(m, desired_tile)
    m_pad = pl.cdiv(m, tile_m) * tile_m
    if m_pad != m:                                       # no silently dropped rows
        grouped = jnp.pad(grouped, ((0, 0), (0, m_pad - m), (0, 0)))

    out = pl.pallas_call(
        functools.partial(_mlp1_maxpool_kernel, kp=kp, p=p, h2=h2),
        out_shape=jax.ShapeDtypeStruct((m_pad, h2), jnp.float32),
        grid=(m_pad // tile_m,),
        in_specs=[
            pl.BlockSpec((kp, tile_m, pcin), lambda i: (0, i, 0)),
            pl.BlockSpec((pcin, ph1), lambda i: (0, 0)),
            pl.BlockSpec((1, ph1), lambda i: (0, 0)),
            pl.BlockSpec((ph1, ph2), lambda i: (0, 0)),
            pl.BlockSpec((1, ph2), lambda i: (0, 0)),
        ],
        out_specs=pl.BlockSpec((tile_m, h2), lambda i: (i, 0)),
        compiler_params=_compiler_params(),
    )(grouped, w1_blk, b1_blk, w2_blk, b2_blk)
    return out[:m]


def run_mlp23(grouped, identity, w2, b2, w3, b3, w4, b4, *, p):
    """grouped: (K2/p, M, p*cin2) bf16, identity: (M, 64) f32 -> (M, 64) f32."""
    kp, m, pcin = grouped.shape
    w2_blk = _block_diag(w2, p)                          # (p*67, p*64) bf16
    b2_blk = jnp.tile(b2, (1, p))                        # (1, p*64) f32
    ph2 = w2_blk.shape[1]
    h2 = ph2 // p
    h3, h4 = w3.shape[1], w4.shape[1]

    desired_tile, _ = _hw_config()
    tile_m = _choose_tile_m(m, desired_tile)
    m_pad = pl.cdiv(m, tile_m) * tile_m
    if m_pad != m:
        grouped = jnp.pad(grouped, ((0, 0), (0, m_pad - m), (0, 0)))
        identity = jnp.pad(identity, ((0, m_pad - m), (0, 0)))

    out = pl.pallas_call(
        functools.partial(_mlp23_residual_kernel, kp=kp, p=p, h2=h2),
        out_shape=jax.ShapeDtypeStruct((m_pad, h4), jnp.float32),
        grid=(m_pad // tile_m,),
        in_specs=[
            pl.BlockSpec((kp, tile_m, pcin), lambda i: (0, i, 0)),
            pl.BlockSpec((tile_m, h2), lambda i: (i, 0)),
            pl.BlockSpec((pcin, ph2), lambda i: (0, 0)),
            pl.BlockSpec((1, ph2), lambda i: (0, 0)),
            pl.BlockSpec((h2, h3), lambda i: (0, 0)),
            pl.BlockSpec((1, h3), lambda i: (0, 0)),
            pl.BlockSpec((h3, h4), lambda i: (0, 0)),
            pl.BlockSpec((1, h4), lambda i: (0, 0)),
        ],
        out_specs=pl.BlockSpec((tile_m, h4), lambda i: (i, 0)),
        compiler_params=_compiler_params(),
    )(grouped, identity, w2_blk, b2_blk, w3, b3, w4, b4)
    return out[:m]


# ------------------- sampling / grouping glue (plain JAX) ------------------ #
# TODO(synk): furthestsampling_batchflat / ballquery_batchflat are sequential,
# data-dependent CUDA ops; kept as plain-JAX glue (equal batch sizes).
def _fps_single(pts, n_sample):
    np_ = pts.shape[0]

    def body(i, carry):
        dist, far, inds = carry
        inds = inds.at[i].set(far)
        d = jnp.sum((pts - pts[far]) ** 2, axis=-1)
        dist = jnp.minimum(dist, d)
        far = jnp.argmax(dist).astype(jnp.int32)
        return dist, far, inds

    init = (jnp.full((np_,), 1e10, jnp.float32), jnp.int32(0),
            jnp.zeros((n_sample,), jnp.int32))
    _, _, inds = lax.fori_loop(0, n_sample, body, init)
    return inds


def _ball_query_single(points, queries, radius, k):
    """PointNet++ ball-query semantics: first k neighbors (in index order)
    within radius; remaining slots padded with the first hit."""
    npts = points.shape[0]
    d2 = jnp.sum((queries[:, None, :] - points[None, :, :]) ** 2, axis=-1)
    cand = jnp.where(d2 < radius * radius,
                     jnp.arange(npts, dtype=jnp.int32)[None, :],
                     jnp.int32(npts))
    cand = jnp.sort(cand, axis=1)[:, :k]
    first = cand[:, :1]
    cand = jnp.where(cand >= npts, first, cand)
    return jnp.minimum(cand, npts - 1).astype(jnp.int32)


# ------------------------------- parameters -------------------------------- #
def _fold_bn(w, gamma, beta, mean, var, eps=BN_EPS):
    # BN (eval) folded into the conv weight/bias; weight bf16 for the MXU,
    # bias f32 for the f32 epilogue.  For strict f32 parity with PyTorch keep
    # weights f32 and use precision=lax.Precision.HIGHEST instead.
    scale = gamma / jnp.sqrt(var + eps)
    w_folded = (w * scale[None, :]).astype(jnp.bfloat16)
    b_folded = (beta - mean * scale)[None, :].astype(jnp.float32)
    return w_folded, b_folded


def init_params(key, mlp_dim):
    c_in1 = mlp_dim + 3           # 35
    c_h1 = mlp_dim                # 32
    c_h2 = mlp_dim * 2            # 64
    c_in2 = c_h2 + 3              # 67
    c_h3 = mlp_dim * 2 * 4        # 256

    def conv_w(k, cin, cout):
        return 0.05 * jax.random.normal(k, (cin, cout), jnp.float32)

    def bn(k, c):
        k1, k2, k3, k4 = jax.random.split(k, 4)
        gamma = 1.0 + 0.1 * jax.random.normal(k1, (c,), jnp.float32)
        beta = 0.1 * jax.random.normal(k2, (c,), jnp.float32)
        mean = 0.1 * jax.random.normal(k3, (c,), jnp.float32)
        var = 1.0 + 0.1 * jax.random.uniform(k4, (c,), jnp.float32)
        return gamma, beta, mean, var

    ks = jax.random.split(key, 10)
    return {
        "mlp1a": _fold_bn(conv_w(ks[0], c_in1, c_h1), *bn(ks[1], c_h1)),
        "mlp1b": _fold_bn(conv_w(ks[2], c_h1, c_h2), *bn(ks[3], c_h2)),
        "mlp2":  _fold_bn(conv_w(ks[4], c_in2, c_h2), *bn(ks[5], c_h2)),
        "mlp3a": _fold_bn(conv_w(ks[6], c_h2, c_h3), *bn(ks[7], c_h3)),
        "mlp3b": _fold_bn(conv_w(ks[8], c_h3, c_h2), *bn(ks[9], c_h2)),
    }


# ------------------------------- forward pass ------------------------------ #
def local_aggregator_forward(params, locs, feats, batch_size):
    n_total = locs.shape[0]
    npb = n_total // batch_size
    locs_b = locs.reshape(batch_size, npb, 3)
    m = batch_size * N_SAMPLE

    # ---- furthest point sampling (per batch, equal sizes) ----
    fps_local = jax.vmap(lambda pnts: _fps_single(pnts, N_SAMPLE))(locs_b)   # (B, S)
    fps_inds = fps_local + (jnp.arange(batch_size, dtype=jnp.int32) * npb)[:, None]
    fps_inds_flat = fps_inds.reshape(-1)
    fps_locs = locs[fps_inds_flat]                                           # (B*S, 3)
    fps_locs_b = fps_locs.reshape(batch_size, N_SAMPLE, 3)

    # ---- ball query 1 over raw points: gather in packed, neighbor-chunk-major layout ----
    # TODO(synk): fuse this gather/normalize/concat into the mlp1 kernel
    # (scalar-prefetch of the indices + in-kernel DMA gather).
    p1 = _choose_pack(N_NEIGHBOR)
    kp1 = N_NEIGHBOR // p1
    nb_local = jax.vmap(
        lambda pnts, q: _ball_query_single(pnts, q, RADIUS, N_NEIGHBOR))(locs_b, fps_locs_b)
    nb_global = nb_local + (jnp.arange(batch_size, dtype=jnp.int32) * npb)[:, None, None]
    idx1 = nb_global.reshape(m, kp1, p1).transpose(1, 0, 2)                  # (K/p, M, p)
    gx1 = (locs[idx1] - fps_locs[None, :, None, :]) / RADIUS                 # (K/p, M, p, 3)
    gf1 = feats[idx1]                                                        # (K/p, M, p, C)
    grouped1 = jnp.concatenate([gx1, gf1], axis=-1).reshape(
        kp1, m, p1 * (3 + feats.shape[-1])).astype(jnp.bfloat16)

    new_features = run_mlp1(grouped1, *params["mlp1a"], *params["mlp1b"], p=p1)   # (M, 64) f32
    identity = new_features

    # ---- ball query 2 over fps points: same packed layout ----
    p2 = _choose_pack(N_NEIGHBOR_POST)
    kp2 = N_NEIGHBOR_POST // p2
    radius_post = 2.0 * RADIUS
    nb2 = jax.vmap(
        lambda pnts: _ball_query_single(pnts, pnts, radius_post, N_NEIGHBOR_POST))(fps_locs_b)
    idx2 = nb2.reshape(batch_size, N_SAMPLE, kp2, p2).transpose(2, 0, 1, 3)  # (K2/p, B, S, p)
    nf_b = new_features.reshape(batch_size, N_SAMPLE, -1)

    gather_b = jax.vmap(lambda src, idx: src[idx], in_axes=(0, 1), out_axes=1)
    gx2 = gather_b(fps_locs_b, idx2).reshape(kp2, m, p2, 3)                  # (K2/p, M, p, 3)
    gx2 = (gx2 - fps_locs[None, :, None, :]) / radius_post
    gf2 = gather_b(nf_b, idx2).reshape(kp2, m, p2, -1)                       # (K2/p, M, p, 64)
    grouped2 = jnp.concatenate([gx2, gf2], axis=-1).reshape(
        kp2, m, p2 * (3 + nf_b.shape[-1])).astype(jnp.bfloat16)

    # ---- SharedMLP2 (no activation) + max-pool + Conv1d bottleneck + residual + ReLU ----
    new_features4 = run_mlp23(grouped2, identity,
                              *params["mlp2"], *params["mlp3a"], *params["mlp3b"],
                              p=p2)                                          # (M, 64) f32

    return new_features4, fps_inds, fps_locs_b


# ----------------------------------- main ---------------------------------- #
if __name__ == "__main__":
    key = jax.random.PRNGKey(0)
    k_loc, k_feat, k_param = jax.random.split(key, 3)

    batch_size = 2
    points_per_batch = 256
    n_points = batch_size * points_per_batch                 # 512

    locs = jax.random.uniform(k_loc, (n_points, 3), jnp.float32)               # [512, 3]
    feats = 0.1 * jax.random.normal(k_feat, (n_points, MLP_DIM), jnp.float32)  # [512, 32]
    params = init_params(k_param, MLP_DIM)

    fwd = jax.jit(functools.partial(local_aggregator_forward, batch_size=batch_size))
    out_feats, fps_inds, fps_locs = fwd(params, locs, feats)
    jax.block_until_ready((out_feats, fps_inds, fps_locs))

    assert out_feats.shape == (batch_size * N_SAMPLE, MLP_DIM * 2)
    assert fps_inds.shape == (batch_size, N_SAMPLE)
    assert fps_locs.shape == (batch_size, N_SAMPLE, 3)
    assert bool(jnp.all(jnp.isfinite(out_feats)))
    print("KERNEL_OK")
</pallas_src>

<mosaic_0001>
module attributes {stable_mosaic.version = 11 : i64} {
  func.func @_mlp1_maxpool_kernel(%arg0: i32, %arg1: memref<4x16x140xbf16, #tpu.memory_space<vmem>>, %arg2: memref<140x128xbf16, #tpu.memory_space<vmem>>, %arg3: memref<1x128xf32, #tpu.memory_space<vmem>>, %arg4: memref<128x256xbf16, #tpu.memory_space<vmem>>, %arg5: memref<1x256xf32, #tpu.memory_space<vmem>>, %arg6: memref<16x64xf32, #tpu.memory_space<vmem>>) attributes {dimension_semantics = [#tpu.dimension_semantics<parallel>], iteration_bounds = array<i64: 8>, scalar_prefetch = 0 : i64, scratch_operands = 0 : i64, tpu.core_type = #tpu.core_type<tc>, window_params = [{transform_indices = @transform_0, window_bounds = array<i64: 4, 16, 140>}, {pipeline_mode = #tpu.pipeline_mode<synchronous>, transform_indices = @transform_1, window_bounds = array<i64: 140, 128>}, {pipeline_mode = #tpu.pipeline_mode<synchronous>, transform_indices = @transform_2, window_bounds = array<i64: 1, 128>}, {pipeline_mode = #tpu.pipeline_mode<synchronous>, transform_indices = @transform_3, window_bounds = array<i64: 128, 256>}, {pipeline_mode = #tpu.pipeline_mode<synchronous>, transform_indices = @transform_4, window_bounds = array<i64: 1, 256>}, {transform_indices = @transform_5, window_bounds = array<i64: 16, 64>}]} {
    %c0 = arith.constant 0 : index
    %c0_0 = arith.constant 0 : index
    %0 = vector.load %arg2[%c0, %c0_0] : memref<140x128xbf16, #tpu.memory_space<vmem>>, vector<140x128xbf16>
    %c0_1 = arith.constant 0 : index
    %c0_2 = arith.constant 0 : index
    %1 = vector.load %arg4[%c0_1, %c0_2] : memref<128x256xbf16, #tpu.memory_space<vmem>>, vector<128x256xbf16>
    %c0_3 = arith.constant 0 : index
    %c0_4 = arith.constant 0 : index
    %2 = vector.load %arg3[%c0_3, %c0_4] : memref<1x128xf32, #tpu.memory_space<vmem>>, vector<1x128xf32>
    %3 = vector.shape_cast %2 : vector<1x128xf32> to vector<1x128xf32>
    %4 = vector.broadcast %3 : vector<1x128xf32> to vector<16x128xf32>
    %c0_5 = arith.constant 0 : index
    %c0_6 = arith.constant 0 : index
    %5 = vector.load %arg5[%c0_5, %c0_6] : memref<1x256xf32, #tpu.memory_space<vmem>>, vector<1x256xf32>
    %6 = vector.shape_cast %5 : vector<1x256xf32> to vector<1x256xf32>
    %7 = vector.broadcast %6 : vector<1x256xf32> to vector<16x256xf32>
    %cst = arith.constant 0xFF800000 : f32
    %8 = vector.broadcast %cst : f32 to vector<16x256xf32>
    %c0_7 = arith.constant 0 : index
    %c0_8 = arith.constant 0 : index
    %c0_9 = arith.constant 0 : index
    %9 = vector.load %arg1[%c0_7, %c0_8, %c0_9] : memref<4x16x140xbf16, #tpu.memory_space<vmem>>, vector<1x16x140xbf16>
    %10 = vector.shape_cast %9 : vector<1x16x140xbf16> to vector<16x140xbf16>
    %cst_10 = arith.constant dense<0.000000e+00> : vector<16x128xf32>
    %11 = tpu.matmul %10, %0, %cst_10 {dimension_numbers = #tpu.dot_dimension_numbers<[1], [0], [0], [1], [0, 0, 1, 1], [], []>} : vector<16x140xbf16>, vector<140x128xbf16>, vector<16x128xf32> -> vector<16x128xf32>
    %12 = arith.addf %11, %4 : vector<16x128xf32>
    %cst_11 = arith.constant 0.000000e+00 : f32
    %13 = vector.broadcast %cst_11 : f32 to vector<16x128xf32>
    %14 = arith.maximumf %12, %13 : vector<16x128xf32>
    %15 = arith.truncf %14 : vector<16x128xf32> to vector<16x128xbf16>
    %cst_12 = arith.constant dense<0.000000e+00> : vector<16x256xf32>
    %16 = tpu.matmul %15, %1, %cst_12 {dimension_numbers = #tpu.dot_dimension_numbers<[1], [0], [0], [1], [0, 0, 1, 1], [], []>} : vector<16x128xbf16>, vector<128x256xbf16>, vector<16x256xf32> -> vector<16x256xf32>
    %17 = arith.addf %16, %7 : vector<16x256xf32>
    %cst_13 = arith.constant 0.000000e+00 : f32
    %18 = vector.broadcast %cst_13 : f32 to vector<16x256xf32>
    %19 = arith.maximumf %17, %18 : vector<16x256xf32>
    %20 = arith.maximumf %8, %19 : vector<16x256xf32>
    %c1 = arith.constant 1 : index
    %c0_14 = arith.constant 0 : index
    %c0_15 = arith.constant 0 : index
    %21 = vector.load %arg1[%c1, %c0_14, %c0_15] : memref<4x16x140xbf16, #tpu.memory_space<vmem>>, vector<1x16x140xbf16>
    %22 = vector.shape_cast %21 : vector<1x16x140xbf16> to vector<16x140xbf16>
    %cst_16 = arith.constant dense<0.000000e+00> : vector<16x128xf32>
    %23 = tpu.matmul %22, %0, %cst_16 {dimension_numbers = #tpu.dot_dimension_numbers<[1], [0], [0], [1], [0, 0, 1, 1], [], []>} : vector<16x140xbf16>, vector<140x128xbf16>, vector<16x128xf32> -> vector<16x128xf32>
    %24 = arith.addf %23, %4 : vector<16x128xf32>
    %cst_17 = arith.constant 0.000000e+00 : f32
    %25 = vector.broadcast %cst_17 : f32 to vector<16x128xf32>
    %26 = arith.maximumf %24, %25 : vector<16x128xf32>
    %27 = arith.truncf %26 : vector<16x128xf32> to vector<16x128xbf16>
    %cst_18 = arith.constant dense<0.000000e+00> : vector<16x256xf32>
    %28 = tpu.matmul %27, %1, %cst_18 {dimension_numbers = #tpu.dot_dimension_numbers<[1], [0], [0], [1], [0, 0, 1, 1], [], []>} : vector<16x128xbf16>, vector<128x256xbf16>, vector<16x256xf32> -> vector<16x256xf32>
    %29 = arith.addf %28, %7 : vector<16x256xf32>
    %cst_19 = arith.constant 0.000000e+00 : f32
    %30 = vector.broadcast %cst_19 : f32 to vector<16x256xf32>
    %31 = arith.maximumf %29, %30 : vector<16x256xf32>
    %32 = arith.maximumf %20, %31 : vector<16x256xf32>
    %c2 = arith.constant 2 : index
    %c0_20 = arith.constant 0 : index
    %c0_21 = arith.constant 0 : index
    %33 = vector.load %arg1[%c2, %c0_20, %c0_21] : memref<4x16x140xbf16, #tpu.memory_space<vmem>>, vector<1x16x140xbf16>
    %34 = vector.shape_cast %33 : vector<1x16x140xbf16> to vector<16x140xbf16>
    %cst_22 = arith.constant dense<0.000000e+00> : vector<16x128xf32>
    %35 = tpu.matmul %34, %0, %cst_22 {dimension_numbers = #tpu.dot_dimension_numbers<[1], [0], [0], [1], [0, 0, 1, 1], [], []>} : vector<16x140xbf16>, vector<140x128xbf16>, vector<16x128xf32> -> vector<16x128xf32>
    %36 = arith.addf %35, %4 : vector<16x128xf32>
    %cst_23 = arith.constant 0.000000e+00 : f32
    %37 = vector.broadcast %cst_23 : f32 to vector<16x128xf32>
    %38 = arith.maximumf %36, %37 : vector<16x128xf32>
    %39 = arith.truncf %38 : vector<16x128xf32> to vector<16x128xbf16>
    %cst_24 = arith.constant dense<0.000000e+00> : vector<16x256xf32>
    %40 = tpu.matmul %39, %1, %cst_24 {dimension_numbers = #tpu.dot_dimension_numbers<[1], [0], [0], [1], [0, 0, 1, 1], [], []>} : vector<16x128xbf16>, vector<128x256xbf16>, vector<16x256xf32> -> vector<16x256xf32>
    %41 = arith.addf %40, %7 : vector<16x256xf32>
    %cst_25 = arith.constant 0.000000e+00 : f32
    %42 = vector.broadcast %cst_25 : f32 to vector<16x256xf32>
    %43 = arith.maximumf %41, %42 : vector<16x256xf32>
    %44 = arith.maximumf %32, %43 : vector<16x256xf32>
    %c3 = arith.constant 3 : index
    %c0_26 = arith.constant 0 : index
    %c0_27 = arith.constant 0 : index
    %45 = vector.load %arg1[%c3, %c0_26, %c0_27] : memref<4x16x140xbf16, #tpu.memory_space<vmem>>, vector<1x16x140xbf16>
    %46 = vector.shape_cast %45 : vector<1x16x140xbf16> to vector<16x140xbf16>
    %cst_28 = arith.constant dense<0.000000e+00> : vector<16x128xf32>
    %47 = tpu.matmul %46, %0, %cst_28 {dimension_numbers = #tpu.dot_dimension_numbers<[1], [0], [0], [1], [0, 0, 1, 1], [], []>} : vector<16x140xbf16>, vector<140x128xbf16>, vector<16x128xf32> -> vector<16x128xf32>
    %48 = arith.addf %47, %4 : vector<16x128xf32>
    %cst_29 = arith.constant 0.000000e+00 : f32
    %49 = vector.broadcast %cst_29 : f32 to vector<16x128xf32>
    %50 = arith.maximumf %48, %49 : vector<16x128xf32>
    %51 = arith.truncf %50 : vector<16x128xf32> to vector<16x128xbf16>
    %cst_30 = arith.constant dense<0.000000e+00> : vector<16x256xf32>
    %52 = tpu.matmul %51, %1, %cst_30 {dimension_numbers = #tpu.dot_dimension_numbers<[1], [0], [0], [1], [0, 0, 1, 1], [], []>} : vector<16x128xbf16>, vector<128x256xbf16>, vector<16x256xf32> -> vector<16x256xf32>
    %53 = arith.addf %52, %7 : vector<16x256xf32>
    %cst_31 = arith.constant 0.000000e+00 : f32
    %54 = vector.broadcast %cst_31 : f32 to vector<16x256xf32>
    %55 = arith.maximumf %53, %54 : vector<16x256xf32>
    %56 = arith.maximumf %44, %55 : vector<16x256xf32>
    %57 = vector.extract_strided_slice %56 {offsets = [0, 0], sizes = [16, 64], strides = [1, 1]} : vector<16x256xf32> to vector<16x64xf32>
    %58 = vector.extract_strided_slice %56 {offsets = [0, 64], sizes = [16, 64], strides = [1, 1]} : vector<16x256xf32> to vector<16x64xf32>
    %59 = arith.maximumf %57, %58 : vector<16x64xf32>
    %60 = vector.extract_strided_slice %56 {offsets = [0, 128], sizes = [16, 64], strides = [1, 1]} : vector<16x256xf32> to vector<16x64xf32>
    %61 = arith.maximumf %59, %60 : vector<16x64xf32>
    %62 = vector.extract_strided_slice %56 {offsets = [0, 192], sizes = [16, 64], strides = [1, 1]} : vector<16x256xf32> to vector<16x64xf32>
    %63 = arith.maximumf %61, %62 : vector<16x64xf32>
    %c0_32 = arith.constant 0 : index
    %c0_33 = arith.constant 0 : index
    %64 = vector.load %arg6[%c0_32, %c0_33] : memref<16x64xf32, #tpu.memory_space<vmem>>, vector<16x64xf32>
    tpu.vector_store %arg6[%c0_32, %c0_33], %63 {strides = array<i32>} : memref<16x64xf32, #tpu.memory_space<vmem>>, vector<16x64xf32>,
    return
  }
  func.func @transform_0(%arg0: i32) -> (i32, i32, i32) {
    %c0_i32 = arith.constant 0 : i32
    %c0_i32_0 = arith.constant 0 : i32
    %c0_i32_1 = arith.constant 0 : i32
    return %c0_i32, %arg0, %c0_i32_0 : i32, i32, i32
  }
  func.func @transform_1(%arg0: i32) -> (i32, i32) {
    %c0_i32 = arith.constant 0 : i32
    %c0_i32_0 = arith.constant 0 : i32
    %c0_i32_1 = arith.constant 0 : i32
    return %c0_i32, %c0_i32_0 : i32, i32
  }
  func.func @transform_2(%arg0: i32) -> (i32, i32) {
    %c0_i32 = arith.constant 0 : i32
    %c0_i32_0 = arith.constant 0 : i32
    %c0_i32_1 = arith.constant 0 : i32
    return %c0_i32, %c0_i32_0 : i32, i32
  }
  func.func @transform_3(%arg0: i32) -> (i32, i32) {
    %c0_i32 = arith.constant 0 : i32
    %c0_i32_0 = arith.constant 0 : i32
    %c0_i32_1 = arith.constant 0 : i32
    return %c0_i32, %c0_i32_0 : i32, i32
  }
  func.func @transform_4(%arg0: i32) -> (i32, i32) {
    %c0_i32 = arith.constant 0 : i32
    %c0_i32_0 = arith.constant 0 : i32
    %c0_i32_1 = arith.constant 0 : i32
    return %c0_i32, %c0_i32_0 : i32, i32
  }
  func.func @transform_5(%arg0: i32) -> (i32, i32) {
    %c0_i32 = arith.constant 0 : i32
    %c0_i32_0 = arith.constant 0 : i32
    return %arg0, %c0_i32 : i32, i32
  }
}

module attributes {stable_mosaic.version = 11 : i64} {
  func.func @_mlp23_residual_kernel(%arg0: i32, %arg1: memref<4x16x268xbf16, #tpu.memory_space<vmem>>, %arg2: memref<16x64xf32, #tpu.memory_space<vmem>>, %arg3: memref<268x256xbf16, #tpu.memory_space<vmem>>, %arg4: memref<1x256xf32, #tpu.memory_space<vmem>>, %arg5: memref<64x256xbf16, #tpu.memory_space<vmem>>, %arg6: memref<1x256xf32, #tpu.memory_space<vmem>>, %arg7: memref<256x64xbf16, #tpu.memory_space<vmem>>, %arg8: memref<1x64xf32, #tpu.memory_space<vmem>>, %arg9: memref<16x64xf32, #tpu.memory_space<vmem>>) attributes {dimension_semantics = [#tpu.dimension_semantics<parallel>], iteration_bounds = array<i64: 8>, scalar_prefetch = 0 : i64, scratch_operands = 0 : i64, tpu.core_type = #tpu.core_type<tc>, window_params = [{transform_indices = @transform_0, window_bounds = array<i64: 4, 16, 268>}, {transform_indices = @transform_1, window_bounds = array<i64: 16, 64>}, {pipeline_mode = #tpu.pipeline_mode<synchronous>, transform_indices = @transform_2, window_bounds = array<i64: 268, 256>}, {pipeline_mode = #tpu.pipeline_mode<synchronous>, transform_indices = @transform_3, window_bounds = array<i64: 1, 256>}, {pipeline_mode = #tpu.pipeline_mode<synchronous>, transform_indices = @transform_4, window_bounds = array<i64: 64, 256>}, {pipeline_mode = #tpu.pipeline_mode<synchronous>, transform_indices = @transform_5, window_bounds = array<i64: 1, 256>}, {pipeline_mode = #tpu.pipeline_mode<synchronous>, transform_indices = @transform_6, window_bounds = array<i64: 256, 64>}, {pipeline_mode = #tpu.pipeline_mode<synchronous>, transform_indices = @transform_7, window_bounds = array<i64: 1, 64>}, {transform_indices = @transform_8, window_bounds = array<i64: 16, 64>}]} {
    %c0 = arith.constant 0 : index
    %c0_0 = arith.constant 0 : index
    %0 = vector.load %arg3[%c0, %c0_0] : memref<268x256xbf16, #tpu.memory_space<vmem>>, vector<268x256xbf16>
    %c0_1 = arith.constant 0 : index
    %c0_2 = arith.constant 0 : index
    %1 = vector.load %arg4[%c0_1, %c0_2] : memref<1x256xf32, #tpu.memory_space<vmem>>, vector<1x256xf32>
    %2 = vector.shape_cast %1 : vector<1x256xf32> to vector<1x256xf32>
    %3 = vector.broadcast %2 : vector<1x256xf32> to vector<16x256xf32>
    %cst = arith.constant 0xFF800000 : f32
    %4 = vector.broadcast %cst : f32 to vector<16x256xf32>
    %c0_3 = arith.constant 0 : index
    %c0_4 = arith.constant 0 : index
    %c0_5 = arith.constant 0 : index
    %5 = vector.load %arg1[%c0_3, %c0_4, %c0_5] : memref<4x16x268xbf16, #tpu.memory_space<vmem>>, vector<1x16x268xbf16>
    %6 = vector.shape_cast %5 : vector<1x16x268xbf16> to vector<16x268xbf16>
    %cst_6 = arith.constant dense<0.000000e+00> : vector<16x256xf32>
    %7 = tpu.matmul %6, %0, %cst_6 {dimension_numbers = #tpu.dot_dimension_numbers<[1], [0], [0], [1], [0, 0, 1, 1], [], []>} : vector<16x268xbf16>, vector<268x256xbf16>, vector<16x256xf32> -> vector<16x256xf32>
    %8 = arith.addf %7, %3 : vector<16x256xf32>
    %9 = arith.maximumf %4, %8 : vector<16x256xf32>
    %c1 = arith.constant 1 : index
    %c0_7 = arith.constant 0 : index
    %c0_8 = arith.constant 0 : index
    %10 = vector.load %arg1[%c1, %c0_7, %c0_8] : memref<4x16x268xbf16, #tpu.memory_space<vmem>>, vector<1x16x268xbf16>
    %11 = vector.shape_cast %10 : vector<1x16x268xbf16> to vector<16x268xbf16>
    %cst_9 = arith.constant dense<0.000000e+00> : vector<16x256xf32>
    %12 = tpu.matmul %11, %0, %cst_9 {dimension_numbers = #tpu.dot_dimension_numbers<[1], [0], [0], [1], [0, 0, 1, 1], [], []>} : vector<16x268xbf16>, vector<268x256xbf16>, vector<16x256xf32> -> vector<16x256xf32>
    %13 = arith.addf %12, %3 : vector<16x256xf32>
    %14 = arith.maximumf %9, %13 : vector<16x256xf32>
    %c2 = arith.constant 2 : index
    %c0_10 = arith.constant 0 : index
    %c0_11 = arith.constant 0 : index
    %15 = vector.load %arg1[%c2, %c0_10, %c0_11] : memref<4x16x268xbf16, #tpu.memory_space<vmem>>, vector<1x16x268xbf16>
    %16 = vector.shape_cast %15 : vector<1x16x268xbf16> to vector<16x268xbf16>
    %cst_12 = arith.constant dense<0.000000e+00> : vector<16x256xf32>
    %17 = tpu.matmul %16, %0, %cst_12 {dimension_numbers = #tpu.dot_dimension_numbers<[1], [0], [0], [1], [0, 0, 1, 1], [], []>} : vector<16x268xbf16>, vector<268x256xbf16>, vector<16x256xf32> -> vector<16x256xf32>
    %18 = arith.addf %17, %3 : vector<16x256xf32>
    %19 = arith.maximumf %14, %18 : vector<16x256xf32>
    %c3 = arith.constant 3 : index
    %c0_13 = arith.constant 0 : index
    %c0_14 = arith.constant 0 : index
    %20 = vector.load %arg1[%c3, %c0_13, %c0_14] : memref<4x16x268xbf16, #tpu.memory_space<vmem>>, vector<1x16x268xbf16>
    %21 = vector.shape_cast %20 : vector<1x16x268xbf16> to vector<16x268xbf16>
    %cst_15 = arith.constant dense<0.000000e+00> : vector<16x256xf32>
    %22 = tpu.matmul %21, %0, %cst_15 {dimension_numbers = #tpu.dot_dimension_numbers<[1], [0], [0], [1], [0, 0, 1, 1], [], []>} : vector<16x268xbf16>, vector<268x256xbf16>, vector<16x256xf32> -> vector<16x256xf32>
    %23 = arith.addf %22, %3 : vector<16x256xf32>
    %24 = arith.maximumf %19, %23 : vector<16x256xf32>
    %25 = vector.extract_strided_slice %24 {offsets = [0, 0], sizes = [16, 64], strides = [1, 1]} : vector<16x256xf32> to vector<16x64xf32>
    %26 = vector.extract_strided_slice %24 {offsets = [0, 64], sizes = [16, 64], strides = [1, 1]} : vector<16x256xf32> to vector<16x64xf32>
    %27 = arith.maximumf %25, %26 : vector<16x64xf32>
    %28 = vector.extract_strided_slice %24 {offsets = [0, 128], sizes = [16, 64], strides = [1, 1]} : vector<16x256xf32> to vector<16x64xf32>
    %29 = arith.maximumf %27, %28 : vector<16x64xf32>
    %30 = vector.extract_strided_slice %24 {offsets = [0, 192], sizes = [16, 64], strides = [1, 1]} : vector<16x256xf32> to vector<16x64xf32>
    %31 = arith.maximumf %29, %30 : vector<16x64xf32>
    %32 = arith.truncf %31 : vector<16x64xf32> to vector<16x64xbf16>
    %c0_16 = arith.constant 0 : index
    %c0_17 = arith.constant 0 : index
    %33 = vector.load %arg5[%c0_16, %c0_17] : memref<64x256xbf16, #tpu.memory_space<vmem>>, vector<64x256xbf16>
    %cst_18 = arith.constant dense<0.000000e+00> : vector<16x256xf32>
    %34 = tpu.matmul %32, %33, %cst_18 {dimension_numbers = #tpu.dot_dimension_numbers<[1], [0], [0], [1], [0, 0, 1, 1], [], []>} : vector<16x64xbf16>, vector<64x256xbf16>, vector<16x256xf32> -> vector<16x256xf32>
    %c0_19 = arith.constant 0 : index
    %c0_20 = arith.constant 0 : index
    %35 = vector.load %arg6[%c0_19, %c0_20] : memref<1x256xf32, #tpu.memory_space<vmem>>, vector<1x256xf32>
    %36 = vector.broadcast %35 : vector<1x256xf32> to vector<16x256xf32>
    %37 = arith.addf %34, %36 : vector<16x256xf32>
    %cst_21 = arith.constant 0.000000e+00 : f32
    %38 = vector.broadcast %cst_21 : f32 to vector<16x256xf32>
    %39 = arith.maximumf %37, %38 : vector<16x256xf32>
    %40 = arith.truncf %39 : vector<16x256xf32> to vector<16x256xbf16>
    %c0_22 = arith.constant 0 : index
    %c0_23 = arith.constant 0 : index
    %41 = vector.load %arg7[%c0_22, %c0_23] : memref<256x64xbf16, #tpu.memory_space<vmem>>, vector<256x64xbf16>
    %cst_24 = arith.constant dense<0.000000e+00> : vector<16x64xf32>
    %42 = tpu.matmul %40, %41, %cst_24 {dimension_numbers = #tpu.dot_dimension_numbers<[1], [0], [0], [1], [0, 0, 1, 1], [], []>} : vector<16x256xbf16>, vector<256x64xbf16>, vector<16x64xf32> -> vector<16x64xf32>
    %c0_25 = arith.constant 0 : index
    %c0_26 = arith.constant 0 : index
    %43 = vector.load %arg8[%c0_25, %c0_26] : memref<1x64xf32, #tpu.memory_space<vmem>>, vector<1x64xf32>
    %44 = vector.broadcast %43 : vector<1x64xf32> to vector<16x64xf32>
    %45 = arith.addf %42, %44 : vector<16x64xf32>
    %c0_27 = arith.constant 0 : index
    %c0_28 = arith.constant 0 : index
    %46 = vector.load %arg2[%c0_27, %c0_28] : memref<16x64xf32, #tpu.memory_space<vmem>>, vector<16x64xf32>
    %47 = arith.addf %45, %46 : vector<16x64xf32>
    %cst_29 = arith.constant 0.000000e+00 : f32
    %48 = vector.broadcast %cst_29 : f32 to vector<16x64xf32>
    %49 = arith.maximumf %47, %48 : vector<16x64xf32>
    %c0_30 = arith.constant 0 : index
    %c0_31 = arith.constant 0 : index
    %50 = vector.load %arg9[%c0_30, %c0_31] : memref<16x64xf32, #tpu.memory_space<vmem>>, vector<16x64xf32>
    tpu.vector_store %arg9[%c0_30, %c0_31], %49 {strides = array<i32>} : memref<16x64xf32, #tpu.memory_space<vmem>>, vector<16x64xf32>,
    return
  }
  func.func @transform_0(%arg0: i32) -> (i32, i32, i32) {
    %c0_i32 = arith.constant 0 : i32
    %c0_i32_0 = arith.constant 0 : i32
    %c0_i32_1 = arith.constant 0 : i32
    return %c0_i32, %arg0, %c0_i32_0 : i32, i32, i32
  }
  func.func @transform_1(%arg0: i32) -> (i32, i32) {
    %c0_i32 = arith.constant 0 : i32
    %c0_i32_0 = arith.constant 0 : i32
    return %arg0, %c0_i32 : i32, i32
  }
  func.func @transform_2(%arg0: i32) -> (i32, i32) {
    %c0_i32 = arith.constant 0 : i32
    %c0_i32_0 = arith.constant 0 : i32
    %c0_i32_1 = arith.constant 0 : i32
    return %c0_i32, %c0_i32_0 : i32, i32
  }
  func.func @transform_3(%arg0: i32) -> (i32, i32) {
    %c0_i32 = arith.constant 0 : i32
    %c0_i32_0 = arith.constant 0 : i32
    %c0_i32_1 = arith.constant 0 : i32
    return %c0_i32, %c0_i32_0 : i32, i32
  }
  func.func @transform_4(%arg0: i32) -> (i32, i32) {
    %c0_i32 = arith.constant 0 : i32
    %c0_i32_0 = arith.constant 0 : i32
    %c0_i32_1 = arith.constant 0 : i32
    return %c0_i32, %c0_i32_0 : i32, i32
  }
  func.func @transform_5(%arg0: i32) -> (i32, i32) {
    %c0_i32 = arith.constant 0 : i32
    %c0_i32_0 = arith.constant 0 : i32
    %c0_i32_1 = arith.constant 0 : i32
    return %c0_i32, %c0_i32_0 : i32, i32
  }
  func.func @transform_6(%arg0: i32) -> (i32, i32) {
    %c0_i32 = arith.constant 0 : i32
    %c0_i32_0 = arith.constant 0 : i32
    %c0_i32_1 = arith.constant 0 : i32
    return %c0_i32, %c0_i32_0 : i32, i32
  }
  func.func @transform_7(%arg0: i32) -> (i32, i32) {
    %c0_i32 = arith.constant 0 : i32
    %c0_i32_0 = arith.constant 0 : i32
    %c0_i32_1 = arith.constant 0 : i32
    return %c0_i32, %c0_i32_0 : i32, i32
  }
  func.func @transform_8(%arg0: i32) -> (i32, i32) {
    %c0_i32 = arith.constant 0 : i32
    %c0_i32_0 = arith.constant 0 : i32
    return %arg0, %c0_i32 : i32, i32
  }
}

</mosaic_0001>

<bundles_post_ra>
// kernel: custom-call.6
= control target key start
LH: loop header
LB: loop body
LE: loop exit
PB: predicated region body
PF: predicated region fallthrough
CT: control target
= control target key end

     0   :  { %s6_s0 = inlined_call_operand.vmem [shape: f32[2,256], index: 0, kind: output, shape index: {}]  }

// kernel: local_aggregator_forward.2
= control target key start
LH: loop header
LB: loop body
LE: loop exit
PB: predicated region body
PF: predicated region fallthrough
CT: control target
= control target key end

     0   :  { %s1192_s18 = smov 0   ;;  %s1194_s19 = smov 0   ;;  %s1559_s0 = inlined_call_operand.vmem [shape: bf16[4,128,140], index: 0, kind: input, shape index: {}]   ;;  %s1560_s1 = inlined_call_operand.vmem [shape: bf16[140,128], index: 1, kind: input, shape index: {}]   ;;  %s1561_s2 = inlined_call_operand.vmem [shape: f32[1,128], index: 2, kind: input, shape index: {}]   ;;  %s1562_s3 = inlined_call_operand.vmem [shape: bf16[128,256], index: 3, kind: input, shape index: {}]   ;;  %s1563_s4 = inlined_call_operand.vmem [shape: f32[1,256], index: 4, kind: input, shape index: {}]   ;;  %s1564_s5 = inlined_call_operand.vmem [shape: f32[128,64], index: 5, kind: output, shape index: {}]  }
   0x1   :  { %s1196_s20 = smov 0  }
   0x2 LB: > { %s1005_s21 = sadd.s32 4294967295, %s1158_s20   ;;  %s1209_s22 = sadd.s32 1, %s1158_s20   ;;  %s1158_s20 = sphi %s1196_s20, %s1567_s20   ;;  %s1154_s19 = sphi %s1194_s19, %s1566_s19   ;;  %s1150_s18 = sphi %s1192_s18, %s1565_s18  }
   0x3   : > { %s19_s23 = ssub.s32 %s1158_s20, %s1209_s22  ;;  %s22_s24 = sadd.s32 1, %s1154_s19 }
   0x4   : > { %p20_p0 = scmp.eq.s32.totalorder %s19_s23, 0  ;;  %p29_p1 = scmp.ne.s32.totalorder %s1154_s19, %s1150_s18 }
   0x5   : > { %p30_p2 = scmp.eq.s32.totalorder %s1158_s20, 0  ;;  %p1008_p4 = scmp.ge.s32.totalorder %s1158_s20, 8 }
   0x6   : > { %s1218_s25 = scalar_select %p20_p0, %s1154_s19, %s22_s24  }
   0x7   : > { %p31_p3 = por %p30_p2, %p29_p1  ;;  %177 = sbr.rel (%p1008_p4) target bundleno = 22 (0x16), region = 32 }
   0xe   : > { %180 = sbr.rel (!%p31_p3) target bundleno = 22 (0x16), region = 36  ;;  %s182_s26 = sand.u32 (%p31_p3), 1, %s1154_s19  }
   0xf   : > { %s1064_s27 = sshll.u32 (%p31_p3), %s1158_s20, 4  ;;  %s1009_s28 = sshll.u32 (%p31_p3), %s182_s26, 6 }
  0x10   : > { %s188_s6 = scalar_lea.vmem (%p31_p3), %s1559_s0, %s1064_s27  ;;  %s184_s7 = scalar_lea.vmem (%p31_p3), [#allocation2], %s1009_s28 }
  0x11   : > { %v230_v0 = vld [vmem:[%s188_s6] sm:$0xff] (%p31_p3)  ;;  %v232_v1 = vld [vmem:[%s188_s6 + $0x8] sm:$0xff] (%p31_p3) }
  0x12   : > { %v234_v2 = vld [vmem:[%s188_s6 + $0x80] sm:$0xff] (%p31_p3)  ;;  %231 = vst [vmem:[%s184_s7] sm:$0xff] (%p31_p3), %v230_v0  ;;  %233 = vst [vmem:[%s184_s7 + $0x8] sm:$0xff] (%p31_p3), %v232_v1  ;;  %v236_v3 = vld [vmem:[%s188_s6 + $0x88] sm:$0xff] (%p31_p3) }
  0x13   : > { %235 = vst [vmem:[%s184_s7 + $0x10] sm:$0xff] (%p31_p3), %v234_v2  ;;  %v238_v4 = vld [vmem:[%s188_s6 + $0x100] sm:$0xff] (%p31_p3)  ;;  %v240_v5 = vld [vmem:[%s188_s6 + $0x108] sm:$0xff] (%p31_p3)  ;;  %237 = vst [vmem:[%s184_s7 + $0x18] sm:$0xff] (%p31_p3), %v236_v3 }
  0x14   : > { %239 = vst [vmem:[%s184_s7 + $0x20] sm:$0xff] (%p31_p3), %v238_v4  ;;  %241 = vst [vmem:[%s184_s7 + $0x28] sm:$0xff] (%p31_p3), %v240_v5  ;;  %v242_v6 = vld [vmem:[%s188_s6 + $0x180] sm:$0xff] (%p31_p3)  ;;  %v244_v7 = vld [vmem:[%s188_s6 + $0x188] sm:$0xff] (%p31_p3) }
  0x15   : > { %243 = vst [vmem:[%s184_s7 + $0x30] sm:$0xff] %v242_v6  ;;  %245 = vst [vmem:[%s184_s7 + $0x38] sm:$0xff] %v244_v7 }
  0x16 PF: > { %p1013_p5 = scmp.ge.s32.totalorder %s1158_s20, 1  ;;  %p250_p6 = scmp.lt.s32.totalorder %s1158_s20, 9 }
  0x18   : > { %p251_p7 = pnand %p1013_p5, %p250_p6 }
  0x19   : > { %v1231_v8 = vld [vmem:[%s1560_s1] sm:$0xff] (!%p251_p7)   ;;  %v1160_v9 = vmov (!%p251_p7), 0   ;;  %v1239_v10 = vld [vmem:[%s1560_s1 + $0x8] sm:$0xff] (!%p251_p7)   ;;  %s257_s12 = sand.u32 (!%p251_p7), 1, %s1150_s18   ;;  %v1247_v11 = vld [vmem:[%s1560_s1 + $0x10] sm:$0xff] (!%p251_p7)   ;;  %vm409_vm0 = vcmask (!%p251_p7), 97280   ;;  %v335_v0 = vlaneseq (!%p251_p7) }
  0x1a   : > { %254 = sbr.rel (%p251_p7) target bundleno = 1394 (0x572), region = 74  ;;  %417 = vmatprep.subr.bf16.mxu0 (!%p251_p7), %v1160_v9  ;;  %573 = vmatprep.mubr.bf16.mxu1 (!%p251_p7), %v1160_v9  ;;  %s1014_s13 = sshll.u32 (!%p251_p7), %s257_s12, 6  ;;  %v1253_v12 = vld [vmem:[%s1560_s1 + $0x18] sm:$0xff] (!%p251_p7)   ;;  %v1263_v14 = vld [vmem:[%s1562_s3 + $0x4] ss:$8 sps:$4 sm:$0xff] (!%p251_p7)   ;;  %v1319_v23 = vld [vmem:[%s1560_s1 + $0x30] sm:$0xff] (!%p251_p7)  }
  0x1b   : > { %418 = vmatpush1.bf16.msra.mxu0 (!%p251_p7), %v1231_v8  ;;  %s1255_s23 = scalar_lea.vmem (!%p251_p7), [#allocation2], %s1014_s13  ;;  %v1268_v15 = vld [vmem:[%s1562_s3] ss:$8 sps:$4 sm:$0xff] (!%p251_p7)   ;;  %v1274_v16 = vld [vmem:[%s1562_s3 + $0x14] ss:$8 sps:$4 sm:$0xff] (!%p251_p7)   ;;  %541 = vmatprep.subr.bf16.mxu1 (!%p251_p7), %v1263_v14  ;;  %vm413_vm1 = vcmask (!%p251_p7), 1045504  }
  0x1c   : > { %419 = vmatprep.subr.bf16.mxu0 (!%p251_p7), %v1160_v9  ;;  %v1102_v13 = vld [vmem:[%s1255_s23 + $0x4] ss:$8 sps:$4 sm:$0xff] (!%p251_p7)   ;;  %542 = vmatpush1.bf16.msra.mxu1 (!%p251_p7), %v1268_v15  ;;  %v1287_v18 = vld [vmem:[%s1562_s3 + $0x10] ss:$8 sps:$4 sm:$0xff] (!%p251_p7)   ;;  %v1306_v21 = vld [vmem:[%s1562_s3 + $0x20] ss:$8 sps:$4 sm:$0xff] (!%p251_p7)  }
  0x1d   : > { %1029 = vmatprep.mubr.msk.bf16.mxu0 (!%p251_p7), %vm409_vm0, %v1102_v13  ;;  %v1279_v17 = vld [vmem:[%s1560_s1 + $0x20] sm:$0xff] (!%p251_p7)   ;;  %543 = vmatprep.subr.bf16.mxu1 (!%p251_p7), %v1274_v16  ;;  %v1299_v20 = vld [vmem:[%s1560_s1 + $0x28] sm:$0xff] (!%p251_p7)   ;;  %v1311_v22 = vld [vmem:[%s1562_s3 + $0x34] ss:$8 sps:$4 sm:$0xff] (!%p251_p7)   ;;  %v336_v1 = vshrl.u32 (!%p251_p7), %v335_v0, 7  ;;  %s1015_s7 = sshll.u32 (!%p251_p7), %s1005_s21, 1 }
  0x1e   : > { %v1294_v19 = vld [vmem:[%s1562_s3 + $0x24] ss:$8 sps:$4 sm:$0xff] (!%p251_p7)   ;;  %v1325_v24 = vld [vmem:[%s1562_s3 + $0x30] ss:$8 sps:$4 sm:$0xff] (!%p251_p7)   ;;  %v1344_v27 = vld [vmem:[%s1562_s3 + $0x40] ss:$8 sps:$4 sm:$0xff] (!%p251_p7)  }
  0x1f   : > { %420 = vmatpush1.bf16.msra.mxu0 (!%p251_p7), %v1239_v10  ;;  %v1332_v25 = vld [vmem:[%s1562_s3 + $0x44] ss:$8 sps:$4 sm:$0xff] (!%p251_p7)   ;;  %v1338_v26 = vld [vmem:[%s1560_s1 + $0x38] sm:$0xff] (!%p251_p7)   ;;  %v1100_v32 = vld [vmem:[%s1255_s23] ss:$8 sps:$4 sm:$0xff] (!%p251_p7)   ;;  %v337_v2 = vsub.s32 (!%p251_p7), 0, %v336_v1 }
  0x20   : > { %421 = vmatprep.subr.bf16.mxu0 (!%p251_p7), %v1160_v9  ;;  %544 = vmatpush1.bf16.msra.mxu1 (!%p251_p7), %v1287_v18  ;;  %v1099_v28 = vld [vmem:[%s1560_s1 + $0x40] sm:$0x3f] (!%p251_p7)   ;;  %v1354_v29 = vld [vmem:[%s1562_s3 + $0x54] ss:$8 sps:$4 sm:$0xff] (!%p251_p7)   ;;  %v1361_v30 = vld [vmem:[%s1562_s3 + $0x50] ss:$8 sps:$4 sm:$0xff] (!%p251_p7)  }
  0x21   : > { %545 = vmatprep.subr.bf16.mxu1 %v1294_v19  ;;  %v1364_v31 = vsel %vm413_vm1, %v1099_v28, 0  ;;  %v1386_v33 = vld [vmem:[%s1562_s3 + $0x64] ss:$8 sps:$4 sm:$0xff]   ;;  %v1391_v34 = vld [vmem:[%s1562_s3 + $0x60] ss:$8 sps:$4 sm:$0xff]   ;;  %v341_v4 = vsub.s32 1, %v336_v1 }
  0x22   : > { %v1400_v35 = vld [vmem:[%s1562_s3 + $0x74] ss:$8 sps:$4 sm:$0xff]   ;;  %v1405_v36 = vld [vmem:[%s1562_s3 + $0x70] ss:$8 sps:$4 sm:$0xff]   ;;  %v1416_v37 = vld [vmem:[%s1561_s2] ss:$0 sm:$0xff] }
  0x23   : > { %422 = vmatpush1.bf16.msra.mxu0 %v1247_v11  ;;  %v1127_v46 = vld [vmem:[%s1255_s23 + $0x14] ss:$8 sps:$4 sm:$0xff]   ;;  %v1129_v48 = vld [vmem:[%s1255_s23 + $0x10] ss:$8 sps:$4 sm:$0xff]   ;;  %v1130_v61 = vld [vmem:[%s1255_s23 + $0x24] ss:$8 sps:$4 sm:$0xff]  }
  0x24   : > { %423 = vmatprep.subr.bf16.mxu0 %v1160_v9  ;;  %546 = vmatpush1.bf16.msra.mxu1 %v1306_v21  ;;  %v1132_v63 = vld [vmem:[%s1255_s23 + $0x20] ss:$8 sps:$4 sm:$0xff]   ;;  %p286_p8 = scmp.lt.s32.totalorder %s1015_s7, 15  ;;  %vm940_vm2 = vcmask 523264  }
  0x25   : > { %547 = vmatprep.subr.bf16.mxu1 %v1311_v22  ;;  %v333_v3 = vld [vmem:[%s1563_s4] sm:$0x3] }
  0x26   : > { %v1500_v5 = vrot.slane %v333_v3, %v337_v2  ;;  %v1502_v6 = vrot.slane %v333_v3, %v341_v4  ;;  %s1569_s7 = smov (!%p286_p8, %s1015_s7), 15 }
  0x27   : > { %424 = vmatpush1.bf16.msra.mxu0 %v1253_v12  ;;  %s1016_s8 = sshll.u32 %s1569_s7, 3 }
  0x28   : > { %425 = vmatprep.subr.bf16.mxu0 %v1160_v9  ;;  %548 = vmatpush1.bf16.msra.mxu1 %v1325_v24  ;;  %s289_s11 = scalar_lea.vmem %s1564_s5, %s1016_s8 }
  0x29   : > { %549 = vmatprep.subr.bf16.mxu1 %v1332_v25 }
  0x2b   : > { %426 = vmatpush1.bf16.msra.mxu0 %v1279_v17 }
  0x2c   : > { %427 = vmatprep.subr.bf16.mxu0 %v1160_v9  ;;  %550 = vmatpush1.bf16.msra.mxu1 %v1344_v27 }
  0x2d   : > { %551 = vmatprep.subr.bf16.mxu1 %v1354_v29 }
  0x2f   : > { %428 = vmatpush1.bf16.msra.mxu0 %v1299_v20 }
  0x30   : > { %429 = vmatprep.subr.bf16.mxu0 %v1160_v9  ;;  %552 = vmatpush1.bf16.msra.mxu1 %v1361_v30 }
  0x31   : > { %553 = vmatprep.subr.bf16.mxu1 %v1386_v33 }
  0x33   : > { %430 = vmatpush1.bf16.msra.mxu0 %v1319_v23 }
  0x34   : > { %431 = vmatprep.subr.bf16.mxu0 %v1160_v9  ;;  %554 = vmatpush1.bf16.msra.mxu1 %v1391_v34 }
  0x35   : > { %555 = vmatprep.subr.bf16.mxu1 %v1400_v35 }
  0x37   : > { %432 = vmatpush1.bf16.msra.mxu0 %v1338_v26 }
  0x38   : > { %433 = vmatprep.subr.bf16.mxu0 %v1160_v9  ;;  %556 = vmatpush1.bf16.msra.mxu1 %v1405_v36 }
  0x39   : > { %603 = vmatprep.subr.bf16.mxu1 %v1160_v9 }
  0x3b   : > { %434 = vmatpush1.bf16.msra.mxu0 %v1364_v31 }
  0x3c   : > { %647 = vmatprep.subr.bf16.mxu0 %v1263_v14 }
  0x3e   : > { %450 = vmatmul.mubr.bf16.vlgmr.msra.gmra.mrb[0].mxu0 %v1100_v32 }
  0x3f   : > { %648 = vmatpush1.bf16.msra.mxu0 %v1268_v15  ;;  %679 = vmatprep.mubr.bf16.mxu0 %v1160_v9 }
  0x40   : > { %649 = vmatprep.subr.bf16.mxu0 %v1274_v16 }
  0x43   : > { %650 = vmatpush1.bf16.msra.mxu0 %v1287_v18 }
  0x44   : > { %651 = vmatprep.subr.bf16.mxu0 %v1294_v19 }
  0x47   : > { %652 = vmatpush1.bf16.msra.mxu0 %v1306_v21 }
  0x48   : > { %653 = vmatprep.subr.bf16.mxu0 %v1311_v22 }
  0x4b   : > { %654 = vmatpush1.bf16.msra.mxu0 %v1325_v24 }
  0x4c   : > { %655 = vmatprep.subr.bf16.mxu0 %v1332_v25 }
  0x4f   : > { %656 = vmatpush1.bf16.msra.mxu0 %v1344_v27 }
  0x50   : > { %657 = vmatprep.subr.bf16.mxu0 %v1354_v29 }
  0x53   : > { %658 = vmatpush1.bf16.msra.mxu0 %v1361_v30 }
  0x54   : > { %659 = vmatprep.subr.bf16.mxu0 %v1386_v33 }
  0x57   : > { %660 = vmatpush1.bf16.msra.mxu0 %v1391_v34 }
  0x58   : > { %661 = vmatprep.subr.bf16.mxu0 %v1400_v35 }
  0x5b   : > { %662 = vmatpush1.bf16.msra.mxu0 %v1405_v36 }
  0x5c   : > { %713 = vmatprep.subr.bf16.mxu0 %v1160_v9 }
 0x111   : > { %v451_v38 = vpop.f32.mrb[0].mxu0 }
 0x112   : > { %v452_v39 = vadd.f32 %v1416_v37, %v451_v38  ;;  %v453_v40 = vpop.f32.mrb[1].mxu0 }
 0x113   : > { %v454_v41 = vpop.f32.mrb[2].mxu0 }
 0x114   : > { %v455_v42 = vadd.f32 %v1416_v37, %v454_v41  ;;  %v456_v43 = vpop.f32.mrb[3].mxu0  ;;  %v458_v44 = vmax.f32 %v452_v39, 0.0 }
 0x116   : > { %v459_v45 = vmax.f32 %v455_v42, 0.0 }
 0x118   : > { %v460_v47 = vpack.c.bf16 %v459_v45, %v458_v44 }
 0x11a   : > { %574 = vmatmul.mubr.bf16.vlgmr.msra.gmra.mrb[0].mxu1 %v460_v47 }
 0x11b   : > { %604 = vmatpush1.bf16.msra.mxu1 %v1231_v8  ;;  %1050 = vmatprep.mubr.msk.bf16.mxu1 %vm409_vm0, %v1127_v46 }
 0x11c   : > { %605 = vmatprep.subr.bf16.mxu1 %v1160_v9 }
 0x11f   : > { %606 = vmatpush1.bf16.msra.mxu1 %v1239_v10 }
 0x120   : > { %607 = vmatprep.subr.bf16.mxu1 %v1160_v9 }
 0x123   : > { %608 = vmatpush1.bf16.msra.mxu1 %v1247_v11 }
 0x124   : > { %609 = vmatprep.subr.bf16.mxu1 %v1160_v9 }
 0x127   : > { %610 = vmatpush1.bf16.msra.mxu1 %v1253_v12 }
 0x128   : > { %611 = vmatprep.subr.bf16.mxu1 %v1160_v9 }
 0x12b   : > { %612 = vmatpush1.bf16.msra.mxu1 %v1279_v17 }
 0x12c   : > { %613 = vmatprep.subr.bf16.mxu1 %v1160_v9 }
 0x12f   : > { %614 = vmatpush1.bf16.msra.mxu1 %v1299_v20 }
 0x130   : > { %615 = vmatprep.subr.bf16.mxu1 %v1160_v9 }
 0x133   : > { %616 = vmatpush1.bf16.msra.mxu1 %v1319_v23 }
 0x134   : > { %617 = vmatprep.subr.bf16.mxu1 %v1160_v9 }
 0x137   : > { %618 = vmatpush1.bf16.msra.mxu1 %v1338_v26 }
 0x138   : > { %619 = vmatprep.subr.bf16.mxu1 %v1160_v9 }
 0x13b   : > { %620 = vmatpush1.bf16.msra.mxu1 %v1364_v31 }
 0x13c   : > { %757 = vmatprep.subr.bf16.mxu1 %v1263_v14 }
 0x13e   : > { %636 = vmatmul.mubr.bf16.vlgmr.msra.gmra.mrb[4].mxu1 %v1129_v48 }
 0x13f   : > { %758 = vmatpush1.bf16.msra.mxu1 %v1268_v15  ;;  %789 = vmatprep.mubr.bf16.mxu1 %v1160_v9 }
 0x140   : > { %759 = vmatprep.subr.bf16.mxu1 %v1274_v16 }
 0x143   : > { %760 = vmatpush1.bf16.msra.mxu1 %v1287_v18 }
 0x144   : > { %761 = vmatprep.subr.bf16.mxu1 %v1294_v19 }
 0x147   : > { %762 = vmatpush1.bf16.msra.mxu1 %v1306_v21 }
 0x148   : > { %763 = vmatprep.subr.bf16.mxu1 %v1311_v22 }
 0x14b   : > { %764 = vmatpush1.bf16.msra.mxu1 %v1325_v24 }
 0x14c   : > { %765 = vmatprep.subr.bf16.mxu1 %v1332_v25 }
 0x14f   : > { %766 = vmatpush1.bf16.msra.mxu1 %v1344_v27 }
 0x150   : > { %767 = vmatprep.subr.bf16.mxu1 %v1354_v29 }
 0x153   : > { %768 = vmatpush1.bf16.msra.mxu1 %v1361_v30 }
 0x154   : > { %769 = vmatprep.subr.bf16.mxu1 %v1386_v33 }
 0x157   : > { %770 = vmatpush1.bf16.msra.mxu1 %v1391_v34 }
 0x158   : > { %771 = vmatprep.subr.bf16.mxu1 %v1400_v35 }
 0x15b   : > { %772 = vmatpush1.bf16.msra.mxu1 %v1405_v36 }
 0x15c   : > { %823 = vmatprep.subr.bf16.mxu1 %v1160_v9 }
 0x1ed   : > { %v575_v49 = vpop.f32.mrb[0].mxu1 }
 0x1ee   : > { %v577_v50 = vpop.f32.mrb[1].mxu1  ;;  %v576_v7 = vadd.f32 %v575_v49, %v1500_v5 }
 0x1ef   : > { %v579_v51 = vpop.f32.mrb[2].mxu1  ;;  %v578_v13 = vadd.f32 %v577_v50, %v1502_v6  ;;  %v1133_v50 = vld [vmem:[%s1255_s23 + $0x34] ss:$8 sps:$4 sm:$0xff]  }
 0x1f0   : > { %v581_v52 = vpop.f32.mrb[3].mxu1 }
 0x211   : > { %v637_v53 = vpop.f32.mrb[4].mxu1 }
 0x212   : > { %v638_v54 = vadd.f32 %v1416_v37, %v637_v53  ;;  %v639_v55 = vpop.f32.mrb[5].mxu1 }
 0x213   : > { %v640_v56 = vpop.f32.mrb[6].mxu1 }
 0x214   : > { %v641_v57 = vadd.f32 %v1416_v37, %v640_v56  ;;  %v642_v58 = vpop.f32.mrb[7].mxu1  ;;  %v644_v59 = vmax.f32 %v638_v54, 0.0 }
 0x216   : > { %v645_v60 = vmax.f32 %v641_v57, 0.0 }
 0x218   : > { %v646_v62 = vpack.c.bf16 %v645_v60, %v644_v59 }
 0x21a   : > { %680 = vmatmul.mubr.bf16.vlgmr.msra.gmra.mrb[4].mxu0 %v646_v62 }
 0x21b   : > { %714 = vmatpush1.bf16.msra.mxu0 %v1231_v8  ;;  %1055 = vmatprep.mubr.msk.bf16.mxu0 %vm409_vm0, %v1130_v61 }
 0x21c   : > { %715 = vmatprep.subr.bf16.mxu0 %v1160_v9 }
 0x21f   : > { %716 = vmatpush1.bf16.msra.mxu0 %v1239_v10 }
 0x220   : > { %717 = vmatprep.subr.bf16.mxu0 %v1160_v9 }
 0x223   : > { %718 = vmatpush1.bf16.msra.mxu0 %v1247_v11 }
 0x224   : > { %719 = vmatprep.subr.bf16.mxu0 %v1160_v9 }
 0x227   : > { %720 = vmatpush1.bf16.msra.mxu0 %v1253_v12 }
 0x228   : > { %721 = vmatprep.subr.bf16.mxu0 %v1160_v9 }
 0x22b   : > { %722 = vmatpush1.bf16.msra.mxu0 %v1279_v17 }
 0x22c   : > { %723 = vmatprep.subr.bf16.mxu0 %v1160_v9 }
 0x22f   : > { %724 = vmatpush1.bf16.msra.mxu0 %v1299_v20 }
 0x230   : > { %725 = vmatprep.subr.bf16.mxu0 %v1160_v9 }
 0x233   : > { %726 = vmatpush1.bf16.msra.mxu0 %v1319_v23 }
 0x234   : > { %727 = vmatprep.subr.bf16.mxu0 %v1160_v9 }
 0x237   : > { %728 = vmatpush1.bf16.msra.mxu0 %v1338_v26 }
 0x238   : > { %729 = vmatprep.subr.bf16.mxu0 %v1160_v9 }
 0x23b   : > { %730 = vmatpush1.bf16.msra.mxu0 %v1364_v31 }
 0x23c   : > { %867 = vmatprep.subr.bf16.mxu0 %v1263_v14 }
 0x23e   : > { %746 = vmatmul.mubr.bf16.vlgmr.msra.gmra.mrb[8].mxu0 %v1132_v63 }
 0x23f   : > { %868 = vmatpush1.bf16.msra.mxu0 %v1268_v15  ;;  %899 = vmatprep.mubr.bf16.mxu0 %v1160_v9  ;;  %v580_v15 = vadd.f32 %v579_v51, %v1500_v5 }
 0x240   : > { %869 = vmatprep.subr.bf16.mxu0 %v1274_v16 }
 0x243   : > { %870 = vmatpush1.bf16.msra.mxu0 %v1287_v18 }
 0x244   : > { %871 = vmatprep.subr.bf16.mxu0 %v1294_v19  ;;  %v582_v19 = vadd.f32 %v581_v52, %v1502_v6 }
 0x247   : > { %872 = vmatpush1.bf16.msra.mxu0 %v1306_v21 }
 0x248   : > { %873 = vmatprep.subr.bf16.mxu0 %v1311_v22 }
 0x24b   : > { %874 = vmatpush1.bf16.msra.mxu0 %v1325_v24  ;;  %v584_v24 = vmax.f32 %v576_v7, 0.0 }
 0x24c   : > { %875 = vmatprep.subr.bf16.mxu0 %v1332_v25 }
 0x24f   : > { %876 = vmatpush1.bf16.msra.mxu0 %v1344_v27 }
 0x250   : > { %877 = vmatprep.subr.bf16.mxu0 %v1354_v29  ;;  %v585_v29 = vmax.f32 %v578_v13, 0.0 }
 0x253   : > { %878 = vmatpush1.bf16.msra.mxu0 %v1361_v30 }
 0x254   : > { %879 = vmatprep.subr.bf16.mxu0 %v1386_v33  ;;  %v586_v33 = vmax.f32 %v580_v15, 0.0 }
 0x257   : > { %880 = vmatpush1.bf16.msra.mxu0 %v1391_v34 }
 0x258   : > { %881 = vmatprep.subr.bf16.mxu0 %v1400_v35 }
 0x25b   : > { %882 = vmatpush1.bf16.msra.mxu0 %v1405_v36  ;;  %v587_v36 = vmax.f32 %v582_v19, 0.0 }
 0x2ed   : > { %v681_v14 = vpop.f32.mrb[4].mxu0 }
 0x2ee   : > { %v682_v16 = vadd.f32 %v681_v14, %v1500_v5  ;;  %v683_v18 = vpop.f32.mrb[5].mxu0 }
 0x2ef   : > { %v684_v21 = vadd.f32 %v683_v18, %v1502_v6  ;;  %v685_v22 = vpop.f32.mrb[6].mxu0 }
 0x2f0   : > { %v690_v25 = vmax.f32 %v682_v16, 0.0  ;;  %v686_v27 = vadd.f32 %v685_v22, %v1500_v5  ;;  %v687_v28 = vpop.f32.mrb[7].mxu0 }
 0x2f1   : > { %v691_v30 = vmax.f32 %v684_v21, 0.0  ;;  %v688_v32 = vadd.f32 %v687_v28, %v1502_v6 }
 0x2f2   : > { %v694_v34 = vmax.f32 %v584_v24, %v690_v25  ;;  %v692_v35 = vmax.f32 %v686_v27, 0.0 }
 0x2f3   : > { %v695_v38 = vmax.f32 %v585_v29, %v691_v30  ;;  %v693_v39 = vmax.f32 %v688_v32, 0.0 }
 0x2f4   : > { %v696_v40 = vmax.f32 %v586_v33, %v692_v35 }
 0x2f5   : > { %v697_v41 = vmax.f32 %v587_v36, %v693_v39 }
 0x311   : > { %v747_v42 = vpop.f32.mrb[8].mxu0 }
 0x312   : > { %v748_v43 = vadd.f32 %v1416_v37, %v747_v42  ;;  %v749_v44 = vpop.f32.mrb[9].mxu0 }
 0x313   : > { %v750_v45 = vpop.f32.mrb[10].mxu0 }
 0x314   : > { %v751_v46 = vadd.f32 %v1416_v37, %v750_v45  ;;  %v752_v47 = vpop.f32.mrb[11].mxu0  ;;  %v754_v48 = vmax.f32 %v748_v43, 0.0 }
 0x316   : > { %v755_v49 = vmax.f32 %v751_v46, 0.0 }
 0x318   : > { %v756_v51 = vpack.c.bf16 %v755_v49, %v754_v48 }
 0x31a   : > { %790 = vmatmul.mubr.bf16.vlgmr.msra.gmra.mrb[8].mxu1 %v756_v51 }
 0x31b   : > { %824 = vmatpush1.bf16.msra.mxu1 %v1231_v8  ;;  %1060 = vmatprep.mubr.msk.bf16.mxu1 %vm409_vm0, %v1133_v50  ;;  %v1135_v8 = vld [vmem:[%s1255_s23 + $0x30] ss:$8 sps:$4 sm:$0xff]   ;;  %s1161_s23 = smov 64  }
 0x31c   : > { %825 = vmatprep.subr.bf16.mxu1 %v1160_v9 }
 0x31f   : > { %826 = vmatpush1.bf16.msra.mxu1 %v1239_v10 }
 0x320   : > { %827 = vmatprep.subr.bf16.mxu1 %v1160_v9 }
 0x323   : > { %828 = vmatpush1.bf16.msra.mxu1 %v1247_v11 }
 0x324   : > { %829 = vmatprep.subr.bf16.mxu1 %v1160_v9 }
 0x327   : > { %830 = vmatpush1.bf16.msra.mxu1 %v1253_v12 }
 0x328   : > { %831 = vmatprep.subr.bf16.mxu1 %v1160_v9 }
 0x32b   : > { %832 = vmatpush1.bf16.msra.mxu1 %v1279_v17 }
 0x32c   : > { %833 = vmatprep.subr.bf16.mxu1 %v1160_v9 }
 0x32f   : > { %834 = vmatpush1.bf16.msra.mxu1 %v1299_v20 }
 0x330   : > { %835 = vmatprep.subr.bf16.mxu1 %v1160_v9 }
 0x333   : > { %836 = vmatpush1.bf16.msra.mxu1 %v1319_v23 }
 0x334   : > { %837 = vmatprep.subr.bf16.mxu1 %v1160_v9 }
 0x337   : > { %838 = vmatpush1.bf16.msra.mxu1 %v1338_v26 }
 0x338   : > { %839 = vmatprep.subr.bf16.mxu1 %v1160_v9 }
 0x33b   : > { %840 = vmatpush1.bf16.msra.mxu1 %v1364_v31 }
 0x33e   : > { %856 = vmatmul.mubr.bf16.vlgmr.msra.gmra.mrb[12].mxu1 %v1135_v8 }
 0x3ed   : > { %v791_v10 = vpop.f32.mrb[8].mxu1 }
 0x3ee   : > { %v792_v11 = vadd.f32 %v791_v10, %v1500_v5  ;;  %v793_v12 = vpop.f32.mrb[9].mxu1 }
 0x3ef   : > { %v794_v17 = vadd.f32 %v793_v12, %v1502_v6  ;;  %v795_v20 = vpop.f32.mrb[10].mxu1 }
 0x3f0   : > { %v800_v52 = vmax.f32 %v792_v11, 0.0  ;;  %v796_v23 = vadd.f32 %v795_v20, %v1500_v5  ;;  %v797_v53 = vpop.f32.mrb[11].mxu1 }
 0x3f1   : > { %v801_v54 = vmax.f32 %v794_v17, 0.0  ;;  %v798_v26 = vadd.f32 %v797_v53, %v1502_v6 }
 0x3f2   : > { %v804_v55 = vmax.f32 %v694_v34, %v800_v52  ;;  %v802_v9 = vmax.f32 %v796_v23, 0.0 }
 0x3f3   : > { %v805_v56 = vmax.f32 %v695_v38, %v801_v54  ;;  %v803_v57 = vmax.f32 %v798_v26, 0.0 }
 0x3f4   : > { %v806_v31 = vmax.f32 %v696_v40, %v802_v9 }
 0x3f5   : > { %v807_v58 = vmax.f32 %v697_v41, %v803_v57 }
 0x411   : > { %v857_v59 = vpop.f32.mrb[12].mxu1 }
 0x412   : > { %v858_v60 = vadd.f32 %v1416_v37, %v857_v59  ;;  %v859_v61 = vpop.f32.mrb[13].mxu1 }
 0x413   : > { %v860_v62 = vpop.f32.mrb[14].mxu1 }
 0x414   : > { %v861_v63 = vadd.f32 %v1416_v37, %v860_v62  ;;  %v862_v0 = vpop.f32.mrb[15].mxu1  ;;  %v864_v1 = vmax.f32 %v858_v60, 0.0 }
 0x416   : > { %v865_v2 = vmax.f32 %v861_v63, 0.0 }
 0x418   : > { %v866_v3 = vpack.c.bf16 %v865_v2, %v864_v1 }
 0x41a   : > { %900 = vmatmul.mubr.bf16.vlgmr.msra.gmra.mrb[12].mxu0 %v866_v3 }
 0x4ed   : > { %v901_v4 = vpop.f32.mrb[12].mxu0 }
 0x4ee   : > { %v902_v7 = vadd.f32 %v901_v4, %v1500_v5  ;;  %v903_v13 = vpop.f32.mrb[13].mxu0 }
 0x4ef   : > { %v904_v14 = vadd.f32 %v903_v13, %v1502_v6  ;;  %v905_v15 = vpop.f32.mrb[14].mxu0 }
 0x4f0   : > { %v910_v16 = vmax.f32 %v902_v7, 0.0  ;;  %v906_v18 = vadd.f32 %v905_v15, %v1500_v5  ;;  %v907_v19 = vpop.f32.mrb[15].mxu0 }
 0x4f1   : > { %v911_v21 = vmax.f32 %v904_v14, 0.0  ;;  %v908_v37 = vadd.f32 %v907_v19, %v1502_v6 }
 0x4f2   : > { %v912_v22 = vmax.f32 %v906_v18, 0.0  ;;  %v914_v24 = vmax.f32 %v804_v55, %v910_v16 }
 0x4f3   : > { %v913_v25 = vmax.f32 %v908_v37, 0.0  ;;  %v915_v27 = vmax.f32 %v805_v56, %v911_v21 }
 0x4f4   : > { %v916_v28 = vmax.f32 %v806_v31, %v912_v22  ;;  %920 = vrot.lane.b32.xlu0 %v914_v24, %s1161_s23 }
 0x4f5   : > { %v917_v29 = vmax.f32 %v807_v58, %v913_v25  ;;  %932 = vrot.lane.b32.xlu1 %v915_v27, %s1161_s23 }
 0x4f8   : > { %922 = vrot.lane.b32.xlu0 %v916_v28, %s1161_s23 }
 0x4f9   : > { %934 = vrot.lane.b32.xlu1 %v917_v29, %s1161_s23 }
 0x566   : > { %v921_v5 = vpop.permute.xlu0 %920 }
 0x567   : > { %v926_v30 = vmax.f32 %v914_v24, %v921_v5  ;;  %v933_v32 = vpop.permute.xlu1 %932 }
 0x569   : > { %v928_v6 = vmax.f32 %v926_v30, %v915_v27 }
 0x56a   : > { %v923_v33 = vpop.permute.xlu0 %922 }
 0x56b   : > { %v938_v34 = vmax.f32 %v928_v6, %v933_v32  ;;  %v927_v35 = vmax.f32 %v916_v28, %v923_v33  ;;  %v935_v38 = vpop.permute.xlu1 %934 }
 0x56d   : > { %941 = vst.msk [vmem:[%s289_s11] sm:$0xff] %vm940_vm2, %v938_v34  ;;  %v929_v36 = vmax.f32 %v927_v35, %v917_v29 }
 0x56f   : > { %v939_v39 = vmax.f32 %v929_v36, %v935_v38 }
 0x571   : > { %942 = vst.msk [vmem:[%s289_s11 + $0x8] sm:$0xff] %vm940_vm2, %v939_v39 }
 0x572 PF: > { %p12_p9 = scmp.ge.s32.totalorder %s1209_s22, 10   ;;  %s1565_s18 = smov %s1154_s19 }
 0x573   : > { %s1566_s19 = smov %s1218_s25  ;;  %s1567_s20 = smov %s1209_s22 }
 0x574   :  { %14 = sbr.rel (!%p12_p9) target bundleno = 2 (0x2), region = 116 }

// kernel: local_aggregator_forward.3
= control target key start
LH: loop header
LB: loop body
LE: loop exit
PB: predicated region body
PF: predicated region fallthrough
CT: control target
= control target key end

     0   :  { %s1839_s27 = smov 0   ;;  %s1841_s28 = smov 0   ;;  %s2342_s0 = inlined_call_operand.vmem [shape: bf16[4,128,268], index: 0, kind: input, shape index: {}]   ;;  %s2343_s1 = inlined_call_operand.vmem [shape: f32[128,64], index: 1, kind: input, shape index: {}]   ;;  %s2344_s2 = inlined_call_operand.vmem [shape: bf16[268,256], index: 2, kind: input, shape index: {}]   ;;  %s2345_s3 = inlined_call_operand.vmem [shape: f32[1,256], index: 3, kind: input, shape index: {}]   ;;  %s2346_s4 = inlined_call_operand.vmem [shape: bf16[64,256], index: 4, kind: input, shape index: {}]   ;;  %s2347_s5 = inlined_call_operand.vmem [shape: f32[1,256], index: 5, kind: input, shape index: {}]   ;;  %s2348_s6 = inlined_call_operand.vmem [shape: bf16[256,64], index: 6, kind: input, shape index: {}]   ;;  %s2349_s7 = inlined_call_operand.vmem [shape: f32[1,64], index: 7, kind: input, shape index: {}]   ;;  %s2350_s8 = inlined_call_operand.vmem [shape: f32[128,64], index: 8, kind: output, shape index: {}]  }
   0x1   :  { %s1843_s29 = smov 0  }
   0x2 LB: > { %s1458_s30 = sadd.s32 4294967295, %s1790_s29   ;;  %s1856_s9 = sadd.s32 1, %s1790_s29   ;;  %s1790_s29 = sphi %s1843_s29, %s2353_s29   ;;  %s1786_s28 = sphi %s1841_s28, %s2352_s28   ;;  %s1782_s27 = sphi %s1839_s27, %s2351_s27  }
   0x3   : > { %s22_s10 = ssub.s32 %s1790_s29, %s1856_s9  ;;  %s25_s11 = sadd.s32 1, %s1786_s28 }
   0x4   : > { %p23_p0 = scmp.eq.s32.totalorder %s22_s10, 0  ;;  %p32_p1 = scmp.ne.s32.totalorder %s1786_s28, %s1782_s27 }
   0x5   : > { %p33_p2 = scmp.eq.s32.totalorder %s1790_s29, 0  ;;  %p1461_p4 = scmp.ge.s32.totalorder %s1790_s29, 8 }
   0x6   : > { %s1865_s12 = scalar_select %p23_p0, %s1786_s28, %s25_s11  }
   0x7   : > { %p34_p3 = por %p33_p2, %p32_p1  ;;  %254 = sbr.rel (%p1461_p4) target bundleno = 28 (0x1c), region = 40 }
   0xe   : > { %257 = sbr.rel (!%p34_p3) target bundleno = 28 (0x1c), region = 44  ;;  %s259_s13 = sand.u32 (%p34_p3), 1, %s1786_s28  }
   0xf   : > { %s1635_s14 = smul.u32 (%p34_p3), 24, %s1790_s29 }
  0x10   : > { %s1634_s15 = smul.u32 (%p34_p3), 96, %s259_s13 }
  0x11   : > { %s1873_s18 = scalar_lea.vmem (%p34_p3), %s2342_s0, %s1635_s14 }
  0x12   : > { %v280_v0 = vld [vmem:[%s1873_s18] sm:$0xff] (%p34_p3)  ;;  %v282_v1 = vld [vmem:[%s1873_s18 + $0xc] sm:$0xff] (%p34_p3)  ;;  %s261_s19 = scalar_lea.vmem (%p34_p3), [#allocation2], %s1634_s15  ;;  %v1465_v8 = vld [vmem:[%s1873_s18 + $0x8] sm:$0xf] (%p34_p3) }
  0x13   : > { %v284_v2 = vld [vmem:[%s1873_s18 + $0xc0] sm:$0xff] (%p34_p3)  ;;  %281 = vst [vmem:[%s261_s19] sm:$0xff] (%p34_p3), %v280_v0  ;;  %283 = vst [vmem:[%s261_s19 + $0xc] sm:$0xff] (%p34_p3), %v282_v1  ;;  %v286_v3 = vld [vmem:[%s1873_s18 + $0xcc] sm:$0xff] (%p34_p3) }
  0x14   : > { %285 = vst [vmem:[%s261_s19 + $0x18] sm:$0xff] (%p34_p3), %v284_v2  ;;  %v288_v4 = vld [vmem:[%s1873_s18 + $0x180] sm:$0xff] (%p34_p3)  ;;  %v290_v5 = vld [vmem:[%s1873_s18 + $0x18c] sm:$0xff] (%p34_p3)  ;;  %287 = vst [vmem:[%s261_s19 + $0x24] sm:$0xff] (%p34_p3), %v286_v3 }
  0x15   : > { %289 = vst [vmem:[%s261_s19 + $0x30] sm:$0xff] %v288_v4  ;;  %291 = vst [vmem:[%s261_s19 + $0x3c] sm:$0xff] %v290_v5  ;;  %v292_v6 = vld [vmem:[%s1873_s18 + $0x240] sm:$0xff]  ;;  %v294_v7 = vld [vmem:[%s1873_s18 + $0x24c] sm:$0xff] }
  0x16   : > { %293 = vst [vmem:[%s261_s19 + $0x48] sm:$0xff] %v292_v6  ;;  %295 = vst [vmem:[%s261_s19 + $0x54] sm:$0xff] %v294_v7  ;;  %v1467_v9 = vld [vmem:[%s1873_s18 + $0x14] sm:$0xf]  ;;  %v1469_v10 = vld [vmem:[%s1873_s18 + $0xc8] sm:$0xf] }
  0x17   : > { %1466 = vst [vmem:[%s261_s19 + $0x8] sm:$0xf] %v1465_v8  ;;  %v1471_v11 = vld [vmem:[%s1873_s18 + $0xd4] sm:$0xf]  ;;  %1468 = vst [vmem:[%s261_s19 + $0x14] sm:$0xf] %v1467_v9 }
  0x18   : > { %1470 = vst [vmem:[%s261_s19 + $0x20] sm:$0xf] %v1469_v10  ;;  %1472 = vst [vmem:[%s261_s19 + $0x2c] sm:$0xf] %v1471_v11  ;;  %v1473_v12 = vld [vmem:[%s1873_s18 + $0x188] sm:$0xf] }
  0x19   : > { %v1475_v13 = vld [vmem:[%s1873_s18 + $0x194] sm:$0xf]  ;;  %v1477_v14 = vld [vmem:[%s1873_s18 + $0x248] sm:$0xf]  ;;  %1474 = vst [vmem:[%s261_s19 + $0x38] sm:$0xf] %v1473_v12 }
  0x1a   : > { %1476 = vst [vmem:[%s261_s19 + $0x44] sm:$0xf] %v1475_v13  ;;  %1478 = vst [vmem:[%s261_s19 + $0x50] sm:$0xf] %v1477_v14  ;;  %v1479_v15 = vld [vmem:[%s1873_s18 + $0x254] sm:$0xf] }
  0x1b   : > { %1480 = vst [vmem:[%s261_s19 + $0x5c] sm:$0xf] %v1479_v15 }
  0x1c PF: > { %p1481_p5 = scmp.ge.s32.totalorder %s1790_s29, 1  ;;  %p332_p6 = scmp.lt.s32.totalorder %s1790_s29, 9 }
  0x1e   : > { %p333_p7 = pnand %p1481_p5, %p332_p6 }
  0x1f   : > { %v1896_v16 = vld [vmem:[%s2344_s2 + $0x4] ss:$8 sps:$4 sm:$0xff] (!%p333_p7)   ;;  %v1901_v17 = vld [vmem:[%s2344_s2] ss:$8 sps:$4 sm:$0xff] (!%p333_p7)   ;;  %v1907_v18 = vld [vmem:[%s2344_s2 + $0x14] ss:$8 sps:$4 sm:$0xff] (!%p333_p7)   ;;  %v427_v7 = vlaneseq (!%p333_p7) }
  0x20   : > { %336 = sbr.rel (%p333_p7) target bundleno = 985 (0x3d9), region = 74  ;;  %635 = vmatprep.subr.bf16.mxu0 (!%p333_p7), %v1896_v16  ;;  %744 = vmatprep.subr.bf16.mxu1 (!%p333_p7), %v1896_v16  ;;  %v1914_v19 = vld [vmem:[%s2344_s2 + $0x10] ss:$8 sps:$4 sm:$0xff] (!%p333_p7)   ;;  %v1921_v20 = vld [vmem:[%s2344_s2 + $0x24] ss:$8 sps:$4 sm:$0xff] (!%p333_p7)   ;;  %s339_s22 = sand.u32 (!%p333_p7), 1, %s1782_s27  }
  0x21   : > { %636 = vmatpush1.bf16.msra.mxu0 (!%p333_p7), %v1901_v17  ;;  %745 = vmatpush1.bf16.msra.mxu1 (!%p333_p7), %v1901_v17  ;;  %v1928_v21 = vld [vmem:[%s2344_s2 + $0x20] ss:$8 sps:$4 sm:$0xff] (!%p333_p7)   ;;  %v1935_v22 = vld [vmem:[%s2344_s2 + $0x34] ss:$8 sps:$4 sm:$0xff] (!%p333_p7)   ;;  %v1942_v23 = vld [vmem:[%s2344_s2 + $0x30] ss:$8 sps:$4 sm:$0xff] (!%p333_p7)  }
  0x22   : > { %637 = vmatprep.subr.bf16.mxu0 (!%p333_p7), %v1907_v18  ;;  %746 = vmatprep.subr.bf16.mxu1 (!%p333_p7), %v1907_v18  ;;  %v1949_v24 = vld [vmem:[%s2344_s2 + $0x44] ss:$8 sps:$4 sm:$0xff] (!%p333_p7)   ;;  %v1957_v25 = vld [vmem:[%s2344_s2 + $0x40] ss:$8 sps:$4 sm:$0xff] (!%p333_p7)   ;;  %s1636_s25 = smul.u32 (!%p333_p7), 96, %s339_s22  ;;  %vm628_vm0 = vcmask (!%p333_p7), 1045504  }
  0x23   : > { %v1964_v26 = vld [vmem:[%s2344_s2 + $0x54] ss:$8 sps:$4 sm:$0xff] (!%p333_p7)   ;;  %v1971_v27 = vld [vmem:[%s2344_s2 + $0x50] ss:$8 sps:$4 sm:$0xff] (!%p333_p7)   ;;  %v1978_v28 = vld [vmem:[%s2344_s2 + $0x64] ss:$8 sps:$4 sm:$0xff] (!%p333_p7)  }
  0x24   : > { %s1981_s15 = scalar_lea.vmem (!%p333_p7), [#allocation2], %s1636_s25  ;;  %v1988_v30 = vld [vmem:[%s2344_s2 + $0x60] ss:$8 sps:$4 sm:$0xff] (!%p333_p7)   ;;  %v1995_v31 = vld [vmem:[%s2344_s2 + $0x74] ss:$8 sps:$4 sm:$0xff] (!%p333_p7)   ;;  %v1792_v56 = vmov (!%p333_p7), 0  }
  0x25   : > { %638 = vmatpush1.bf16.msra.mxu0 (!%p333_p7), %v1914_v19  ;;  %747 = vmatpush1.bf16.msra.mxu1 (!%p333_p7), %v1914_v19  ;;  %v1723_v29 = vld [vmem:[%s1981_s15 + $0x4] ss:$12 sps:$4 sm:$0xff] (!%p333_p7)   ;;  %v1729_v32 = vld [vmem:[%s1981_s15 + $0x1c] ss:$12 sps:$4 sm:$0xff] (!%p333_p7)   ;;  %v1721_v52 = vld [vmem:[%s1981_s15] ss:$12 sps:$4 sm:$0xff] (!%p333_p7)  }
  0x26   : > { %639 = vmatprep.subr.bf16.mxu0 (!%p333_p7), %v1921_v20  ;;  %748 = vmatprep.subr.bf16.mxu1 (!%p333_p7), %v1921_v20  ;;  %v2003_v33 = vld [vmem:[%s2344_s2 + $0x70] ss:$8 sps:$4 sm:$0xff] (!%p333_p7)   ;;  %v2010_v34 = vld [vmem:[%s2344_s2 + $0x84] ss:$8 sps:$4 sm:$0xff] (!%p333_p7)   ;;  %v2016_v35 = vld [vmem:[%s2344_s2 + $0x80] ss:$8 sps:$4 sm:$0xff] (!%p333_p7)  }
  0x27   : > { %667 = vmatprep.mubr.bf16.mxu0 %v1723_v29  ;;  %776 = vmatprep.mubr.bf16.mxu1 %v1729_v32  ;;  %v2022_v36 = vld [vmem:[%s2344_s2 + $0x94] ss:$8 sps:$4 sm:$0xff]   ;;  %v2030_v37 = vld [vmem:[%s2344_s2 + $0x90] ss:$8 sps:$4 sm:$0xff]   ;;  %v2038_v38 = vld [vmem:[%s2344_s2 + $0xa4] ss:$8 sps:$4 sm:$0xff]  }
  0x28   : > { %v2044_v39 = vld [vmem:[%s2344_s2 + $0xa0] ss:$8 sps:$4 sm:$0xff]   ;;  %v2049_v40 = vld [vmem:[%s2344_s2 + $0xb4] ss:$8 sps:$4 sm:$0xff]   ;;  %v2058_v41 = vld [vmem:[%s2344_s2 + $0xb0] ss:$8 sps:$4 sm:$0xff]  }
  0x29   : > { %640 = vmatpush1.bf16.msra.mxu0 %v1928_v21  ;;  %749 = vmatpush1.bf16.msra.mxu1 %v1928_v21  ;;  %v2063_v42 = vld [vmem:[%s2344_s2 + $0xc4] ss:$8 sps:$4 sm:$0xff]   ;;  %v2073_v43 = vld [vmem:[%s2344_s2 + $0xc0] ss:$8 sps:$4 sm:$0xff]   ;;  %v2080_v44 = vld [vmem:[%s2344_s2 + $0xd4] ss:$8 sps:$4 sm:$0xff]  }
  0x2a   : > { %641 = vmatprep.subr.bf16.mxu0 %v1935_v22  ;;  %750 = vmatprep.subr.bf16.mxu1 %v1935_v22  ;;  %v2087_v45 = vld [vmem:[%s2344_s2 + $0xd0] ss:$8 sps:$4 sm:$0xff]   ;;  %v2094_v46 = vld [vmem:[%s2344_s2 + $0xe4] ss:$8 sps:$4 sm:$0xff]   ;;  %v2101_v47 = vld [vmem:[%s2344_s2 + $0xe0] ss:$8 sps:$4 sm:$0xff]  }
  0x2b   : > { %v2108_v48 = vld [vmem:[%s2344_s2 + $0xf4] ss:$8 sps:$4 sm:$0xff]   ;;  %v2115_v49 = vld [vmem:[%s2344_s2 + $0xf0] ss:$8 sps:$4 sm:$0xff]   ;;  %vm624_vm1 = vcmask 97280   ;;  %v2240_v9 = vshrl.u32 %v427_v7, 7 }
  0x2c   : > { %v2122_v50 = vld [vmem:[%s2344_s2 + $0x104] ss:$8 sps:$4 sm:$0x3f]   ;;  %v1726_v51 = vld [vmem:[%s2344_s2 + $0x100] ss:$8 sps:$4 sm:$0x3f]  }
  0x2d   : > { %642 = vmatpush1.bf16.msra.mxu0 %v1942_v23  ;;  %751 = vmatpush1.bf16.msra.mxu1 %v1942_v23  ;;  %v1727_v53 = vld [vmem:[%s1981_s15 + $0x18] ss:$12 sps:$4 sm:$0xff]   ;;  %v2135_v54 = vsel %vm628_vm0, %v1726_v51, 0  ;;  %v1730_v57 = vld [vmem:[%s1981_s15 + $0x8] ss:$12 sps:$4 sm:$0xff]   ;;  %v429_v10 = vsub.s32 0, %v2240_v9 }
  0x2e   : > { %643 = vmatprep.subr.bf16.mxu0 %v1949_v24  ;;  %752 = vmatprep.subr.bf16.mxu1 %v1949_v24  ;;  %v1734_v55 = vld [vmem:[%s1981_s15 + $0x4c] ss:$12 sps:$4 sm:$0xff]   ;;  %v1737_v59 = vld [vmem:[%s1981_s15 + $0x34] ss:$12 sps:$4 sm:$0xff]   ;;  %v1738_v61 = vld [vmem:[%s1981_s15 + $0x50] ss:$12 sps:$4 sm:$0xff]  }
  0x2f   : > { %v1731_v58 = vld [vmem:[%s1981_s15 + $0x20] ss:$12 sps:$4 sm:$0xff]   ;;  %v1732_v60 = vld [vmem:[%s1981_s15 + $0x48] ss:$12 sps:$4 sm:$0xff]   ;;  %v1735_v62 = vld [vmem:[%s1981_s15 + $0x30] ss:$12 sps:$4 sm:$0xff]  }
  0x30   : > { %v1739_v63 = vld [vmem:[%s1981_s15 + $0x38] ss:$12 sps:$4 sm:$0xff]   ;;  %v1740_v0 = vld [vmem:[%s2346_s4] ss:$8 sps:$4 sm:$0xff]   ;;  %v1745_v2 = vld [vmem:[%s2346_s4 + $0x14] ss:$8 sps:$4 sm:$0xff]  }
  0x31   : > { %644 = vmatpush1.bf16.msra.mxu0 %v1957_v25  ;;  %753 = vmatpush1.bf16.msra.mxu1 %v1957_v25  ;;  %v1742_v1 = vld [vmem:[%s2346_s4 + $0x4] ss:$8 sps:$4 sm:$0xff]   ;;  %v1743_v3 = vld [vmem:[%s2346_s4 + $0x10] ss:$8 sps:$4 sm:$0xff]   ;;  %v425_v11 = vld [vmem:[%s2345_s3] sm:$0x3] }
  0x32   : > { %645 = vmatprep.subr.bf16.mxu0 %v1964_v26  ;;  %754 = vmatprep.subr.bf16.mxu1 %v1964_v26  ;;  %v433_v13 = vsub.s32 1, %v2240_v9  ;;  %s1793_s15 = smov 64   ;;  %v1755_v7 = vld [vmem:[%s2348_s6 + $0x8] sm:$0xff]   ;;  %vm1143_vm2 = vcmask 523264   ;;  %s1482_s27 = sshll.u32 %s1458_s30, 1 }
  0x33   : > { %p379_p8 = scmp.lt.s32.totalorder %s1482_s27, 15 }
  0x35   : > { %646 = vmatpush1.bf16.msra.mxu0 %v1971_v27  ;;  %755 = vmatpush1.bf16.msra.mxu1 %v1971_v27  ;;  %s2355_s27 = smov (!%p379_p8, %s1482_s27), 15 }
  0x36   : > { %647 = vmatprep.subr.bf16.mxu0 %v1978_v28  ;;  %756 = vmatprep.subr.bf16.mxu1 %v1978_v28  ;;  %s1483_s11 = sshll.u32 %s2355_s27, 3 }
  0x37   : > { %s382_s16 = scalar_lea.vmem %s2343_s1, %s1483_s11  ;;  %s388_s18 = scalar_lea.vmem %s2350_s8, %s1483_s11 }
  0x39   : > { %648 = vmatpush1.bf16.msra.mxu0 %v1988_v30  ;;  %757 = vmatpush1.bf16.msra.mxu1 %v1988_v30 }
  0x3a   : > { %649 = vmatprep.subr.bf16.mxu0 %v1995_v31  ;;  %758 = vmatprep.subr.bf16.mxu1 %v1995_v31 }
  0x3d   : > { %650 = vmatpush1.bf16.msra.mxu0 %v2003_v33  ;;  %759 = vmatpush1.bf16.msra.mxu1 %v2003_v33 }
  0x3e   : > { %651 = vmatprep.subr.bf16.mxu0 %v2010_v34  ;;  %760 = vmatprep.subr.bf16.mxu1 %v2010_v34 }
  0x41   : > { %652 = vmatpush1.bf16.msra.mxu0 %v2016_v35  ;;  %761 = vmatpush1.bf16.msra.mxu1 %v2016_v35 }
  0x42   : > { %653 = vmatprep.subr.bf16.mxu0 %v2022_v36  ;;  %762 = vmatprep.subr.bf16.mxu1 %v2022_v36 }
  0x45   : > { %654 = vmatpush1.bf16.msra.mxu0 %v2030_v37  ;;  %763 = vmatpush1.bf16.msra.mxu1 %v2030_v37 }
  0x46   : > { %655 = vmatprep.subr.bf16.mxu0 %v2038_v38  ;;  %764 = vmatprep.subr.bf16.mxu1 %v2038_v38 }
  0x49   : > { %656 = vmatpush1.bf16.msra.mxu0 %v2044_v39  ;;  %765 = vmatpush1.bf16.msra.mxu1 %v2044_v39 }
  0x4a   : > { %657 = vmatprep.subr.bf16.mxu0 %v2049_v40  ;;  %766 = vmatprep.subr.bf16.mxu1 %v2049_v40 }
  0x4d   : > { %658 = vmatpush1.bf16.msra.mxu0 %v2058_v41  ;;  %767 = vmatpush1.bf16.msra.mxu1 %v2058_v41 }
  0x4e   : > { %659 = vmatprep.subr.bf16.mxu0 %v2063_v42  ;;  %768 = vmatprep.subr.bf16.mxu1 %v2063_v42 }
  0x51   : > { %660 = vmatpush1.bf16.msra.mxu0 %v2073_v43  ;;  %769 = vmatpush1.bf16.msra.mxu1 %v2073_v43 }
  0x52   : > { %661 = vmatprep.subr.bf16.mxu0 %v2080_v44  ;;  %770 = vmatprep.subr.bf16.mxu1 %v2080_v44 }
  0x55   : > { %662 = vmatpush1.bf16.msra.mxu0 %v2087_v45  ;;  %771 = vmatpush1.bf16.msra.mxu1 %v2087_v45 }
  0x56   : > { %663 = vmatprep.subr.bf16.mxu0 %v2094_v46  ;;  %772 = vmatprep.subr.bf16.mxu1 %v2094_v46 }
  0x59   : > { %664 = vmatpush1.bf16.msra.mxu0 %v2101_v47  ;;  %773 = vmatpush1.bf16.msra.mxu1 %v2101_v47 }
  0x5a   : > { %665 = vmatprep.subr.bf16.mxu0 %v2108_v48  ;;  %774 = vmatprep.subr.bf16.mxu1 %v2108_v48 }
  0x5d   : > { %666 = vmatpush1.bf16.msra.mxu0 %v2115_v49  ;;  %775 = vmatpush1.bf16.msra.mxu1 %v2115_v49 }
  0x5e   : > { %1523 = vmatprep.subr.msk.bf16.mxu0 %vm628_vm0, %v2122_v50  ;;  %970 = vmatprep.subr.bf16.mxu1 %v1896_v16 }
  0x60   : > { %668 = vmatmul.mubr.bf16.vlgmr.msra.gmra.mrb[0].mxu0 %v1721_v52  ;;  %777 = vmatmul.mubr.bf16.vlgmr.msra.gmra.mrb[0].mxu1 %v1727_v53 }
  0x61   : > { %679 = vmatpush1.bf16.msra.mxu0 %v2135_v54  ;;  %971 = vmatpush1.bf16.msra.mxu1 %v1901_v17 }
  0x62   : > { %710 = vmatprep.mubr.bf16.mxu0 %v1792_v56  ;;  %972 = vmatprep.subr.bf16.mxu1 %v1907_v18 }
  0x63   : > { %1532 = vmatprep.subr.msk.bf16.mxu0 %vm628_vm0, %v2122_v50  ;;  %1002 = vmatprep.mubr.bf16.mxu1 %v1734_v55  ;;  %v1749_v55 = vld [vmem:[%s2346_s4 + $0x30] ss:$8 sps:$4 sm:$0xff]  }
  0x65   : > { %973 = vmatpush1.bf16.msra.mxu1 %v1914_v19 }
  0x66   : > { %974 = vmatprep.subr.bf16.mxu1 %v1921_v20 }
  0x69   : > { %975 = vmatpush1.bf16.msra.mxu1 %v1928_v21 }
  0x6a   : > { %976 = vmatprep.subr.bf16.mxu1 %v1935_v22 }
  0x6c   : > { %1524 = vmatmul.mubr.msk.bf16.vlgmr.msra.gmra.mrb[0].mxu0 %vm624_vm1, %v1730_v57 }
  0x6d   : > { %788 = vmatpush1.bf16.msra.mxu0 %v2135_v54  ;;  %819 = vmatprep.mubr.bf16.mxu0 %v1792_v56 }
  0x6e   : > { %857 = vmatprep.subr.bf16.mxu0 %v1896_v16  ;;  %977 = vmatpush1.bf16.msra.mxu1 %v1942_v23  ;;  %v430_v16 = vrot.slane %v425_v11, %v429_v10 }
  0x6f   : > { %978 = vmatprep.subr.bf16.mxu1 %v1949_v24 }
  0x72   : > { %979 = vmatpush1.bf16.msra.mxu1 %v1957_v25 }
  0x73   : > { %980 = vmatprep.subr.bf16.mxu1 %v1964_v26 }
  0x74   : > { %1533 = vmatmul.mubr.msk.bf16.vlgmr.msra.gmra.mrb[4].mxu0 %vm624_vm1, %v1731_v58 }
  0x75   : > { %858 = vmatpush1.bf16.msra.mxu0 %v1901_v17  ;;  %889 = vmatprep.mubr.bf16.mxu0 %v1737_v59 }
  0x76   : > { %859 = vmatprep.subr.bf16.mxu0 %v1907_v18  ;;  %981 = vmatpush1.bf16.msra.mxu1 %v1971_v27  ;;  %v434_v18 = vrot.slane %v425_v11, %v433_v13 }
  0x77   : > { %982 = vmatprep.subr.bf16.mxu1 %v1978_v28 }
  0x79   : > { %860 = vmatpush1.bf16.msra.mxu0 %v1914_v19 }
  0x7a   : > { %861 = vmatprep.subr.bf16.mxu0 %v1921_v20  ;;  %983 = vmatpush1.bf16.msra.mxu1 %v1988_v30 }
  0x7b   : > { %984 = vmatprep.subr.bf16.mxu1 %v1995_v31 }
  0x7d   : > { %862 = vmatpush1.bf16.msra.mxu0 %v1928_v21 }
  0x7e   : > { %863 = vmatprep.subr.bf16.mxu0 %v1935_v22  ;;  %985 = vmatpush1.bf16.msra.mxu1 %v2003_v33 }
  0x7f   : > { %986 = vmatprep.subr.bf16.mxu1 %v2010_v34 }
  0x81   : > { %864 = vmatpush1.bf16.msra.mxu0 %v1942_v23 }
  0x82   : > { %865 = vmatprep.subr.bf16.mxu0 %v1949_v24  ;;  %987 = vmatpush1.bf16.msra.mxu1 %v2016_v35 }
  0x83   : > { %988 = vmatprep.subr.bf16.mxu1 %v2022_v36 }
  0x85   : > { %866 = vmatpush1.bf16.msra.mxu0 %v1957_v25 }
  0x86   : > { %867 = vmatprep.subr.bf16.mxu0 %v1964_v26  ;;  %989 = vmatpush1.bf16.msra.mxu1 %v2030_v37 }
  0x87   : > { %990 = vmatprep.subr.bf16.mxu1 %v2038_v38 }
  0x89   : > { %868 = vmatpush1.bf16.msra.mxu0 %v1971_v27 }
  0x8a   : > { %869 = vmatprep.subr.bf16.mxu0 %v1978_v28  ;;  %991 = vmatpush1.bf16.msra.mxu1 %v2044_v39 }
  0x8b   : > { %992 = vmatprep.subr.bf16.mxu1 %v2049_v40 }
  0x8d   : > { %870 = vmatpush1.bf16.msra.mxu0 %v1988_v30 }
  0x8e   : > { %871 = vmatprep.subr.bf16.mxu0 %v1995_v31  ;;  %993 = vmatpush1.bf16.msra.mxu1 %v2058_v41 }
  0x8f   : > { %994 = vmatprep.subr.bf16.mxu1 %v2063_v42 }
  0x91   : > { %872 = vmatpush1.bf16.msra.mxu0 %v2003_v33 }
  0x92   : > { %873 = vmatprep.subr.bf16.mxu0 %v2010_v34  ;;  %995 = vmatpush1.bf16.msra.mxu1 %v2073_v43 }
  0x93   : > { %996 = vmatprep.subr.bf16.mxu1 %v2080_v44 }
  0x95   : > { %874 = vmatpush1.bf16.msra.mxu0 %v2016_v35 }
  0x96   : > { %875 = vmatprep.subr.bf16.mxu0 %v2022_v36  ;;  %997 = vmatpush1.bf16.msra.mxu1 %v2087_v45 }
  0x97   : > { %998 = vmatprep.subr.bf16.mxu1 %v2094_v46 }
  0x99   : > { %876 = vmatpush1.bf16.msra.mxu0 %v2030_v37 }
  0x9a   : > { %877 = vmatprep.subr.bf16.mxu0 %v2038_v38  ;;  %999 = vmatpush1.bf16.msra.mxu1 %v2101_v47 }
  0x9b   : > { %1000 = vmatprep.subr.bf16.mxu1 %v2108_v48 }
  0x9d   : > { %878 = vmatpush1.bf16.msra.mxu0 %v2044_v39 }
  0x9e   : > { %879 = vmatprep.subr.bf16.mxu0 %v2049_v40  ;;  %1001 = vmatpush1.bf16.msra.mxu1 %v2115_v49 }
  0x9f   : > { %1550 = vmatprep.subr.msk.bf16.mxu1 %vm628_vm0, %v2122_v50 }
  0xa1   : > { %880 = vmatpush1.bf16.msra.mxu0 %v2058_v41  ;;  %1003 = vmatmul.mubr.bf16.vlgmr.msra.gmra.mrb[4].mxu1 %v1732_v60 }
  0xa2   : > { %881 = vmatprep.subr.bf16.mxu0 %v2063_v42  ;;  %1014 = vmatpush1.bf16.msra.mxu1 %v2135_v54 }
  0xa3   : > { %1045 = vmatprep.mubr.bf16.mxu1 %v1792_v56 }
  0xa5   : > { %882 = vmatpush1.bf16.msra.mxu0 %v2073_v43  ;;  %v1748_v43 = vld [vmem:[%s2346_s4 + $0x24] ss:$8 sps:$4 sm:$0xff]  }
  0xa6   : > { %883 = vmatprep.subr.bf16.mxu0 %v2080_v44  ;;  %v1746_v44 = vld [vmem:[%s2346_s4 + $0x20] ss:$8 sps:$4 sm:$0xff]  }
  0xa9   : > { %884 = vmatpush1.bf16.msra.mxu0 %v2087_v45 }
  0xaa   : > { %885 = vmatprep.subr.bf16.mxu0 %v2094_v46 }
  0xad   : > { %886 = vmatpush1.bf16.msra.mxu0 %v2101_v47  ;;  %1551 = vmatmul.mubr.msk.bf16.vlgmr.msra.gmra.mrb[4].mxu1 %vm624_vm1, %v1738_v61 }
  0xae   : > { %887 = vmatprep.subr.bf16.mxu0 %v2108_v48 }
  0xb1   : > { %888 = vmatpush1.bf16.msra.mxu0 %v2115_v49 }
  0xb2   : > { %1541 = vmatprep.subr.msk.bf16.mxu0 %vm628_vm0, %v2122_v50  ;;  %v1751_v50 = vld [vmem:[%s2346_s4 + $0x34] ss:$8 sps:$4 sm:$0xff]  }
  0xb4   : > { %890 = vmatmul.mubr.bf16.vlgmr.msra.gmra.mrb[8].mxu0 %v1735_v62 }
  0xb5   : > { %901 = vmatpush1.bf16.msra.mxu0 %v2135_v54  ;;  %932 = vmatprep.mubr.bf16.mxu0 %v1792_v56 }
  0xb6   : > { %1147 = vmatprep.subr.bf16.mxu0 %v1742_v1 }
  0xc0   : > { %1542 = vmatmul.mubr.msk.bf16.vlgmr.msra.gmra.mrb[8].mxu0 %vm624_vm1, %v1739_v63 }
  0xc1   : > { %1179 = vmatprep.mubr.bf16.mxu0 %v1792_v56  ;;  %1148 = vmatpush1.bf16.msra.mxu0 %v1740_v0 }
  0xc2   : > { %1149 = vmatprep.subr.bf16.mxu0 %v1745_v2 }
  0xc5   : > { %1150 = vmatpush1.bf16.msra.mxu0 %v1743_v3  ;;  %v1752_v3 = vld [vmem:[%s2348_s6 + $0x40] sm:$0xff]  }
  0xc6   : > { %1151 = vmatprep.subr.bf16.mxu0 %v1748_v43  ;;  %1580 = vmatprep.subr.bf16.mxu1 %v1752_v3 }
  0xc9   : > { %1152 = vmatpush1.bf16.msra.mxu0 %v1746_v44 }
  0xca   : > { %1153 = vmatprep.subr.bf16.mxu0 %v1751_v50 }
  0xcd   : > { %1154 = vmatpush1.bf16.msra.mxu0 %v1749_v55 }
 0x133   : > { %v778_v4 = vpop.f32.mrb[0].mxu1 }
 0x134   : > { %v780_v5 = vpop.f32.mrb[1].mxu1  ;;  %v779_v19 = vadd.f32 %v778_v4, %v430_v16  ;;  %v1753_v4 = vld [vmem:[%s2348_s6] sm:$0xff]  }
 0x135   : > { %v782_v6 = vpop.f32.mrb[2].mxu1  ;;  %v781_v20 = vadd.f32 %v780_v5, %v434_v18  ;;  %v1754_v5 = vld [vmem:[%s2348_s6 + $0x48] sm:$0xff]   ;;  %1581 = vmatpush3.bf16.msra.mxu1 %v1753_v4 }
 0x136   : > { %v784_v8 = vpop.f32.mrb[3].mxu1  ;;  %v783_v21 = vadd.f32 %v782_v6, %v430_v16  ;;  %1582 = vmatprep.subr.bf16.mxu1 %v1754_v5 }
 0x137   : > { %v785_v23 = vadd.f32 %v784_v8, %v434_v18  ;;  %v1756_v8 = vld [vmem:[%s2348_s6 + $0x50] sm:$0xff]  }
 0x139   : > { %1583 = vmatpush3.bf16.msra.mxu1 %v1755_v7 }
 0x13a   : > { %1584 = vmatprep.subr.bf16.mxu1 %v1756_v8 }
 0x13f   : > { %v712_v12 = vpop.f32.mrb[0].mxu0 }
 0x140   : > { %v714_v14 = vpop.f32.mrb[1].mxu0  ;;  %v1602_v24 = vadd.f32 %v712_v12, %v430_v16  ;;  %v1757_v12 = vld [vmem:[%s2348_s6 + $0x10] sm:$0xff]  }
 0x141   : > { %v716_v15 = vpop.f32.mrb[2].mxu0  ;;  %v1603_v27 = vadd.f32 %v714_v14, %v434_v18  ;;  %v1758_v14 = vld [vmem:[%s2348_s6 + $0x58] sm:$0xff]   ;;  %1585 = vmatpush3.bf16.msra.mxu1 %v1757_v12 }
 0x142   : > { %v718_v17 = vpop.f32.mrb[3].mxu0  ;;  %v1604_v30 = vadd.f32 %v716_v15, %v430_v16  ;;  %v1759_v15 = vld [vmem:[%s2348_s6 + $0x18] sm:$0xff]   ;;  %1586 = vmatprep.subr.bf16.mxu1 %v1758_v14 }
 0x143   : > { %v1605_v34 = vadd.f32 %v718_v17, %v434_v18  ;;  %v1761_v17 = vld [vmem:[%s2348_s6 + $0x20] sm:$0xff]  }
 0x145   : > { %1587 = vmatpush3.bf16.msra.mxu1 %v1759_v15 }
 0x147   : > { %v821_v22 = vpop.f32.mrb[4].mxu0 }
 0x148   : > { %v822_v25 = vadd.f32 %v821_v22, %v779_v19  ;;  %v823_v26 = vpop.f32.mrb[5].mxu0 }
 0x149   : > { %v824_v28 = vadd.f32 %v823_v26, %v781_v20  ;;  %v825_v29 = vpop.f32.mrb[6].mxu0 }
 0x14a   : > { %v830_v31 = vmax.f32 %v1602_v24, %v822_v25  ;;  %v826_v32 = vadd.f32 %v825_v29, %v783_v21  ;;  %v827_v33 = vpop.f32.mrb[7].mxu0 }
 0x14b   : > { %v831_v35 = vmax.f32 %v1603_v27, %v824_v28  ;;  %v828_v36 = vadd.f32 %v827_v33, %v785_v23  ;;  %v1764_v33 = vld [vmem:[%s2348_s6 + $0x70] sm:$0xff]  }
 0x14c   : > { %v832_v37 = vmax.f32 %v1604_v30, %v826_v32  ;;  %v1763_v32 = vld [vmem:[%s2348_s6 + $0x28] sm:$0xff]  }
 0x14d   : > { %v833_v38 = vmax.f32 %v1605_v34, %v828_v36  ;;  %v1765_v34 = vld [vmem:[%s2348_s6 + $0x30] sm:$0xff]   ;;  %v1767_v36 = vld [vmem:[%s2348_s6 + $0x38] sm:$0xff]  }
 0x180   : > { %v1047_v39 = vpop.f32.mrb[4].mxu1 }
 0x181   : > { %v1049_v40 = vpop.f32.mrb[5].mxu1  ;;  %v1618_v51 = vadd.f32 %v1047_v39, %v430_v16 }
 0x182   : > { %v1051_v41 = vpop.f32.mrb[6].mxu1  ;;  %v1619_v56 = vadd.f32 %v1049_v40, %v434_v18 }
 0x183   : > { %v1053_v42 = vpop.f32.mrb[7].mxu1  ;;  %v1620_v59 = vadd.f32 %v1051_v41, %v430_v16 }
 0x184   : > { %v1621_v62 = vadd.f32 %v1053_v42, %v434_v18 }
 0x193   : > { %v934_v45 = vpop.f32.mrb[8].mxu0 }
 0x194   : > { %v1614_v46 = vadd.f32 %v934_v45, %v430_v16  ;;  %v936_v47 = vpop.f32.mrb[9].mxu0 }
 0x195   : > { %v1615_v48 = vadd.f32 %v936_v47, %v434_v18  ;;  %v938_v49 = vpop.f32.mrb[10].mxu0 }
 0x196   : > { %v943_v52 = vmax.f32 %v830_v31, %v1614_v46  ;;  %v1616_v53 = vadd.f32 %v938_v49, %v430_v16  ;;  %v940_v54 = vpop.f32.mrb[11].mxu0  ;;  %v1760_v16 = vld [vmem:[%s2348_s6 + $0x60] sm:$0xff]  }
 0x197   : > { %v944_v57 = vmax.f32 %v831_v35, %v1615_v48  ;;  %v1617_v58 = vadd.f32 %v940_v54, %v434_v18  ;;  %1588 = vmatprep.subr.bf16.mxu1 %v1760_v16  ;;  %v1762_v18 = vld [vmem:[%s2348_s6 + $0x68] sm:$0xff]   ;;  %v1766_v35 = vld [vmem:[%s2348_s6 + $0x78] sm:$0xff]  }
 0x198   : > { %v945_v60 = vmax.f32 %v832_v37, %v1616_v53  ;;  %v1056_v61 = vmax.f32 %v943_v52, %v1618_v51  ;;  %1589 = vmatpush3.bf16.msra.mxu1 %v1761_v17  ;;  %v1091_v37 = vld [vmem:[%s2347_s5] sm:$0x3] }
 0x199   : > { %v1057_v63 = vmax.f32 %v944_v57, %v1619_v56  ;;  %v946_v0 = vmax.f32 %v833_v38, %v1617_v58  ;;  %1590 = vmatprep.subr.bf16.mxu1 %v1762_v18  ;;  %v1096_v38 = vrot.slane %v1091_v37, %v429_v10  ;;  %v1100_v39 = vrot.slane %v1091_v37, %v433_v13  ;;  %v1561_v10 = vld [vmem:[%s2349_s7] ss:$0 sm:$0xff] }
 0x19a   : > { %v1058_v1 = vmax.f32 %v945_v60, %v1620_v59  ;;  %v1372_v56 = vld [vmem:[%s382_s16] sm:$0xff]  ;;  %v1373_v60 = vld [vmem:[%s382_s16 + $0x8] sm:$0xff] }
 0x19b   : > { %v1059_v2 = vmax.f32 %v946_v0, %v1621_v62 }
 0x19c   : > { %v1663_v6 = vpack.i.bf16 %v1058_v1, %v1056_v61  ;;  %1591 = vmatpush3.bf16.msra.mxu1 %v1763_v32 }
 0x19d   : > { %v1668_v11 = vpack.i.bf16 %v1059_v2, %v1057_v63  ;;  %1592 = vmatprep.subr.bf16.mxu1 %v1764_v33 }
 0x19e   : > { %1664 = vrot.lane.b32.xlu0 %v1663_v6, %s1793_s15 }
 0x1a0   : > { %1593 = vmatpush3.bf16.msra.mxu1 %v1765_v34 }
 0x1a1   : > { %1594 = vmatprep.subr.bf16.mxu1 %v1766_v35 }
 0x1a2   : > { %1669 = vrot.lane.b32.xlu0 %v1668_v11, %s1793_s15 }
 0x1a4   : > { %1595 = vmatpush3.bf16.msra.mxu1 %v1767_v36 }
 0x210   : > { %v1665_v19 = vpop.permute.xlu0 %1664 }
 0x211   : > { %v1667_v20 = vunpack.i.h.bf16 %v1665_v19  ;;  %v1666_v21 = vunpack.i.l.bf16 %v1665_v19 }
 0x213   : > { %v1069_v22 = vmax.f32 %v1058_v1, %v1667_v20  ;;  %v1068_v23 = vmax.f32 %v1056_v61, %v1666_v21 }
 0x214   : > { %v1670_v24 = vpop.permute.xlu0 %1669 }
 0x215   : > { %v1672_v25 = vunpack.i.h.bf16 %v1670_v24  ;;  %v1671_v26 = vunpack.i.l.bf16 %v1670_v24  ;;  %v1070_v27 = vmax.f32 %v1068_v23, %v1057_v63  ;;  %v1071_v28 = vmax.f32 %v1069_v22, %v1059_v2 }
 0x217   : > { %v1080_v29 = vmax.f32 %v1070_v27, %v1671_v26  ;;  %v1081_v30 = vmax.f32 %v1071_v28, %v1672_v25 }
 0x219   : > { %v1082_v31 = vpack.c.bf16 %v1081_v30, %v1080_v29 }
 0x21b   : > { %1560 = vmatmul.mubr.msk.bf16.vlgmr.msra.gmra.mrb[12].mxu0 %vm1143_vm2, %v1082_v31 }
 0x2ee   : > { %v1181_v40 = vpop.f32.mrb[12].mxu0 }
 0x2ef   : > { %v1182_v41 = vadd.f32 %v1181_v40, %v1096_v38  ;;  %v1183_v42 = vpop.f32.mrb[13].mxu0 }
 0x2f0   : > { %v1184_v43 = vadd.f32 %v1183_v42, %v1100_v39  ;;  %v1185_v44 = vpop.f32.mrb[14].mxu0 }
 0x2f1   : > { %v1186_v45 = vadd.f32 %v1185_v44, %v1096_v38  ;;  %v1187_v46 = vpop.f32.mrb[15].mxu0  ;;  %v1190_v48 = vmax.f32 %v1182_v41, 0.0 }
 0x2f2   : > { %v1188_v47 = vadd.f32 %v1187_v46, %v1100_v39  ;;  %v1191_v50 = vmax.f32 %v1184_v43, 0.0 }
 0x2f3   : > { %v1192_v49 = vmax.f32 %v1186_v45, 0.0 }
 0x2f4   : > { %v1193_v51 = vmax.f32 %v1188_v47, 0.0 }
 0x2f5   : > { %v1194_v52 = vpack.c.bf16 %v1192_v49, %v1190_v48 }
 0x2f6   : > { %v1195_v53 = vpack.c.bf16 %v1193_v51, %v1191_v50 }
 0x2f8   : > { %1363 = vmatprep.mubr.bf16.mxu1 %v1195_v53 }
 0x2f9   : > { %1364 = vmatmul.mubr.bf16.vlgmr.msra.gmra.mrb[8].mxu1 %v1194_v52 }
 0x3cc   : > { %v1596_v9 = vpop.f32.mrb[8].mxu1 }
 0x3cd   : > { %v1597_v13 = vpop.f32.mrb[9].mxu1 }
 0x3ce   : > { %v1598_v54 = vadd.f32 %v1597_v13, %v1596_v9  ;;  %v1599_v55 = vpop.f32.mrb[10].mxu1 }
 0x3cf   : > { %v1600_v57 = vpop.f32.mrb[11].mxu1 }
 0x3d0   : > { %v1366_v58 = vadd.f32 %v1598_v54, %v1561_v10  ;;  %v1601_v59 = vadd.f32 %v1600_v57, %v1599_v55 }
 0x3d2   : > { %v1374_v61 = vadd.f32 %v1372_v56, %v1366_v58  ;;  %v1369_v62 = vadd.f32 %v1601_v59, %v1561_v10 }
 0x3d4   : > { %v1376_v63 = vmax.f32 %v1374_v61, 0.0  ;;  %v1375_v0 = vadd.f32 %v1373_v60, %v1369_v62 }
 0x3d6   : > { %1378 = vst.msk [vmem:[%s388_s18] sm:$0xff] %vm1143_vm2, %v1376_v63  ;;  %v1377_v1 = vmax.f32 %v1375_v0, 0.0 }
 0x3d8   : > { %1379 = vst.msk [vmem:[%s388_s18 + $0x8] sm:$0xff] %vm1143_vm2, %v1377_v1 }
 0x3d9 PF: > { %p15_p9 = scmp.ge.s32.totalorder %s1856_s9, 10   ;;  %s2351_s27 = smov %s1786_s28 }
 0x3da   : > { %s2352_s28 = smov %s1865_s12  ;;  %s2353_s29 = smov %s1856_s9 }
 0x3db   :  { %17 = sbr.rel (!%p15_p9) target bundleno = 2 (0x2), region = 125 }

</bundles_post_ra>
